<compile_context>
chip_gen: v5e
topology: v5e:2x2
jax: 0.10.0
libtpu: 0.0.40
codegen_flags: <defaults>
</compile_context>

<pallas_src>
import jax
import jax.numpy as jnp
from jax import lax
from jax.experimental import pallas as pl
from jax.experimental.pallas import tpu as pltpu


def _preact_bottleneck_kernel(x_ref, s1_ref, b1_ref, w1_ref,
                              b2_ref, w2_ref,
                              b3_ref, w3_ref,
                              out_ref):
    H, W, Cin = x_ref.shape          # full (bf16) image for this batch element
    TH, _, Cout = out_ref.shape      # row tile written by this grid step
    P = w1_ref.shape[1]
    bf = w1_ref.dtype                # bf16 MXU operand dtype

    r = pl.program_id(1)
    nrt = pl.num_programs(1)
    row0 = pl.multiple_of(r * TH, TH)

    # ---- row tile plus a 1-row halo on each side (clamped; out-of-image rows zeroed below) ----
    top_idx = jnp.maximum(row0 - 1, 0)
    bot_idx = jnp.minimum(row0 + TH, H - 1)
    top = x_ref[pl.ds(top_idx, 1)]                                   # (1, W, Cin)
    mid = x_ref[pl.ds(row0, TH)]                                     # (TH, W, Cin)
    bot = x_ref[pl.ds(bot_idx, 1)]                                   # (1, W, Cin)
    x_slab = jnp.concatenate([top, mid, bot], axis=0).astype(jnp.float32)   # (TH+2, W, Cin)

    # ---- bn1 + relu (f32 VPU), cast once to bf16 for the MXU ----
    h = jnp.maximum(x_slab * s1_ref[...] + b1_ref[...], 0.0).astype(bf)
    # x_slab is dead here; the residual is re-read from the resident x_ref later.

    # ---- conv1 (1x1): channel matmul; bn2 scale pre-folded into w1 -> bias + relu ----
    h1 = jnp.dot(h.reshape((TH + 2) * W, Cin), w1_ref[...],
                 preferred_element_type=jnp.float32)                 # ((TH+2)W, P) f32
    h1 = jnp.maximum(h1 + b2_ref[...], 0.0).reshape(TH + 2, W, P)

    # zero halo rows that fall outside the image (== conv2 zero padding along H);
    # predicate built from a tiny (TH+2,1,1) iota + scalar grid position.
    row_ids = lax.broadcasted_iota(jnp.int32, (TH + 2, 1, 1), 0)
    keep = jnp.logical_and(jnp.logical_or(row_ids > 0, r > 0),
                           jnp.logical_or(row_ids < TH + 1, r < nrt - 1))
    h1 = jnp.where(keep, h1, 0.0)

    # ---- conv2 (3x3, stride 1, pad 1): lateral +-1 shifts via XLU rolls + (1,W,1) column
    #      masks, then 3 accumulating K=3P matmuls (one per ky).  No 9P im2col slab. ----
    flat = h1.reshape((TH + 2) * W, P)
    left_f = pltpu.roll(flat, 1, 0).reshape(TH + 2, W, P)                   # [y,x] <- h1[y,x-1]
    right_f = pltpu.roll(flat, (TH + 2) * W - 1, 0).reshape(TH + 2, W, P)   # [y,x] <- h1[y,x+1]
    col_ids = lax.broadcasted_iota(jnp.int32, (1, W, 1), 1)
    center = h1.astype(bf)
    left = jnp.where(col_ids >= 1, left_f, 0.0).astype(bf)
    right = jnp.where(col_ids <= W - 2, right_f, 0.0).astype(bf)

    h2 = jnp.zeros((TH * W, P), jnp.float32)
    for ky in range(3):                                              # static 3-way unroll
        slab = jnp.concatenate(
            [left[ky:ky + TH], center[ky:ky + TH], right[ky:ky + TH]], axis=-1)  # (TH,W,3P) bf16
        h2 = h2 + jnp.dot(slab.reshape(TH * W, 3 * P), w2_ref[ky],
                          preferred_element_type=jnp.float32)

    # ---- bn3 (scale pre-folded into w2): bias + relu ----
    h2 = jnp.maximum(h2 + b3_ref[...], 0.0).astype(bf)

    # ---- conv3 (1x1) -> 4P channels ----
    h3 = jnp.dot(h2, w3_ref[...], preferred_element_type=jnp.float32)       # (TH*W, 4P)

    # ---- residual add (identity path): re-read the resident x rows (cheap vld) ----
    res = x_ref[pl.ds(row0, TH)].astype(jnp.float32)                        # (TH, W, Cin==4P)
    out_ref[...] = (h3.reshape(TH, W, Cout) + res).astype(out_ref.dtype)


def _default_vmem_limit_bytes():
    # v5e / v6e have 128 MiB physical VMEM -> be generous; v7x has 64 MiB -> leave headroom.
    try:
        kind = jax.devices()[0].device_kind.lower()
    except Exception:
        kind = ""
    if "v5" in kind or "v6" in kind:
        return 96 * 1024 * 1024
    return 48 * 1024 * 1024


def preact_bottleneck_nhwc(x, p, *, tile_h=None, vmem_limit_bytes=None):
    """Fused pre-activation bottleneck.  NHWC bf16 in / NHWC bf16 out (hot-path entry).

    Chain blocks through this function so activations stay bf16 NHWC in HBM.
    """
    N, H, W, Cin = x.shape
    P = p["w1"].shape[1]
    assert Cin == 4 * P, "identity residual requires inplanes == 4*planes"

    bf = jnp.bfloat16
    x = x.astype(bf)                                   # bf16 HBM activations

    if tile_h is None:
        # Largest divisor of H with tile_h*W <= 2048 (matmul M dim), preferring tiles whose
        # (tile_h+2)*W flattened slab is sublane-aligned (keeps pltpu.roll copy-free).
        best = None
        for cand in range(H, 0, -1):
            if H % cand != 0 or cand * W > 2048:
                continue
            if best is None:
                best = cand
            if ((cand + 2) * W) % 8 == 0:
                best = cand
                break
        tile_h = best if best is not None else 1
    assert H % tile_h == 0
    num_row_tiles = H // tile_h

    if vmem_limit_bytes is None:
        vmem_limit_bytes = _default_vmem_limit_bytes()

    # bf16 weights with the bn2/bn3 scales folded in (only biases remain in-kernel).
    w1 = (p["w1"] * p["s2"]).astype(bf)                               # (Cin, P)
    w2 = (p["w2"] * p["s3"].reshape(1, 1, P)).reshape(3, 3 * P, P).astype(bf)  # [ky, kx*P+i, o]
    w3 = p["w3"].astype(bf)                                           # (P, 4P)

    return pl.pallas_call(
        _preact_bottleneck_kernel,
        out_shape=jax.ShapeDtypeStruct((N, H, W, 4 * P), bf),
        grid=(N, num_row_tiles),
        in_specs=[
            # full image per batch element; block index constant across the row axis
            # -> fetched once per image, stays resident while row tiles stream out
            pl.BlockSpec((None, H, W, Cin), lambda n, r: (n, 0, 0, 0)),
            pl.BlockSpec((1, Cin), lambda n, r: (0, 0)),       # s1
            pl.BlockSpec((1, Cin), lambda n, r: (0, 0)),       # b1
            pl.BlockSpec((Cin, P), lambda n, r: (0, 0)),       # w1 (bn2 scale folded)
            pl.BlockSpec((1, P), lambda n, r: (0, 0)),         # b2
            pl.BlockSpec((3, 3 * P, P), lambda n, r: (0, 0, 0)),  # w2 per-ky (bn3 scale folded)
            pl.BlockSpec((1, P), lambda n, r: (0, 0)),         # b3
            pl.BlockSpec((P, 4 * P), lambda n, r: (0, 0)),     # w3
        ],
        out_specs=pl.BlockSpec((None, tile_h, W, 4 * P), lambda n, r: (n, r, 0, 0)),
        compiler_params=pltpu.CompilerParams(
            # row tiles write disjoint output blocks -> both axes independent (v7x megacore)
            dimension_semantics=("parallel", "parallel"),
            vmem_limit_bytes=vmem_limit_bytes,
        ),
    )(x, p["s1"], p["b1"], w1, p["b2"], w2, p["b3"], w3)


def preact_bottleneck(x_nchw, p, *, tile_h=None):
    """NCHW / f32 compatibility wrapper (matches the PyTorch module's layout).

    TODO(synk): in a full ResNet keep activations bf16 NHWC end-to-end and call
    preact_bottleneck_nhwc directly to avoid these boundary transposes/casts.
    """
    x = jnp.transpose(x_nchw, (0, 2, 3, 1))                           # -> NHWC
    out = preact_bottleneck_nhwc(x, p, tile_h=tile_h)                 # bf16 NHWC
    return jnp.transpose(out, (0, 3, 1, 2)).astype(x_nchw.dtype)      # -> NCHW


def _fold_bn(kg, kb, km, kv, c, eps=1e-5):
    gamma = jax.random.uniform(kg, (c,), jnp.float32, 0.5, 1.5)
    beta = 0.1 * jax.random.normal(kb, (c,), jnp.float32)
    rmean = 0.1 * jax.random.normal(km, (c,), jnp.float32)
    rvar = jax.random.uniform(kv, (c,), jnp.float32, 0.5, 1.5)
    scale = gamma / jnp.sqrt(rvar + eps)
    bias = beta - rmean * scale
    return scale.reshape(1, c), bias.reshape(1, c)


def init_params(key, inplanes, planes):
    assert inplanes == 4 * planes, "identity residual requires inplanes == 4*planes"
    ks = jax.random.split(key, 15)
    s1, b1 = _fold_bn(ks[0], ks[1], ks[2], ks[3], inplanes)
    s2, b2 = _fold_bn(ks[4], ks[5], ks[6], ks[7], planes)
    s3, b3 = _fold_bn(ks[8], ks[9], ks[10], ks[11], planes)

    bnd1 = 1.0 / jnp.sqrt(inplanes * 1.0)
    w1 = jax.random.uniform(ks[12], (inplanes, planes), jnp.float32, -bnd1, bnd1)
    bnd2 = 1.0 / jnp.sqrt(planes * 9.0)
    w2 = jax.random.uniform(ks[13], (9, planes, planes), jnp.float32, -bnd2, bnd2)
    bnd3 = 1.0 / jnp.sqrt(planes * 1.0)
    w3 = jax.random.uniform(ks[14], (planes, 4 * planes), jnp.float32, -bnd3, bnd3)

    return dict(s1=s1, b1=b1, w1=w1, s2=s2, b2=b2, w2=w2, s3=s3, b3=b3, w3=w3)


def ref_forward(x_nchw, p):
    """Pure-JAX reference with the same quantization points as the kernel:
    bf16 HBM activations, bf16 MXU operands (scales folded into weights), f32 math."""
    bf = jnp.bfloat16
    P = p["w1"].shape[1]
    x = jnp.transpose(x_nchw, (0, 2, 3, 1)).astype(bf)                # bf16 HBM activations
    xf = x.astype(jnp.float32)
    w1 = (p["w1"] * p["s2"]).astype(bf)
    w2 = (p["w2"] * p["s3"].reshape(1, 1, P)).reshape(3, 3, P, P).astype(bf)   # [ky, kx, I, O]
    w3 = p["w3"].astype(bf)

    h = jnp.maximum(xf * p["s1"] + p["b1"], 0.0).astype(bf)
    h1 = jnp.einsum("nhwc,cp->nhwp", h, w1, preferred_element_type=jnp.float32)
    h1 = jnp.maximum(h1 + p["b2"], 0.0)
    h2 = lax.conv_general_dilated(h1.astype(bf), w2, window_strides=(1, 1),
                                  padding=((1, 1), (1, 1)),
                                  dimension_numbers=("NHWC", "HWIO", "NHWC"),
                                  preferred_element_type=jnp.float32)
    h2 = jnp.maximum(h2 + p["b3"], 0.0).astype(bf)
    h3 = jnp.einsum("nhwp,pq->nhwq", h2, w3, preferred_element_type=jnp.float32)
    return jnp.transpose(h3 + xf, (0, 3, 1, 2))                       # f32 (no final rounding)


if __name__ == "__main__":
    key = jax.random.PRNGKey(0)
    kx, kp = jax.random.split(key)

    N, planes = 2, 8
    inplanes = 4 * planes            # 32: identity residual (downsample=None)
    H = W = 16

    x = jax.random.normal(kx, (N, inplanes, H, W), jnp.float32)
    params = init_params(kp, inplanes, planes)

    # tile_h=8 -> 2 row tiles per image: exercises the halo / border-mask path.
    out = preact_bottleneck(x, params, tile_h=8)
    out = jax.block_until_ready(out)

    assert out.shape == (N, inplanes, H, W)
    ref = ref_forward(x, params)
    err = float(jnp.max(jnp.abs(out - ref)))
    # Kernel output is bf16 in HBM while the reference keeps f32 at the end, so the
    # dominant difference is one bf16 ulp of the final result (~0.03 at |out|~4-8).
    if err > 6e-2:
        raise AssertionError(f"kernel/reference mismatch: max abs err = {err}")

    print("KERNEL_OK")
</pallas_src>

<mosaic_0001>
module attributes {stable_mosaic.version = 11 : i64} {
  func.func @_preact_bottleneck_kernel(%arg0: i32, %arg1: i32, %arg2: memref<1x16x16x32xbf16, #tpu.memory_space<vmem>>, %arg3: memref<1x32xf32, #tpu.memory_space<vmem>>, %arg4: memref<1x32xf32, #tpu.memory_space<vmem>>, %arg5: memref<32x8xbf16, #tpu.memory_space<vmem>>, %arg6: memref<1x8xf32, #tpu.memory_space<vmem>>, %arg7: memref<3x24x8xbf16, #tpu.memory_space<vmem>>, %arg8: memref<1x8xf32, #tpu.memory_space<vmem>>, %arg9: memref<8x32xbf16, #tpu.memory_space<vmem>>, %arg10: memref<1x8x16x32xbf16, #tpu.memory_space<vmem>>) attributes {dimension_semantics = [#tpu.dimension_semantics<parallel>, #tpu.dimension_semantics<parallel>], iteration_bounds = array<i64: 2, 2>, scalar_prefetch = 0 : i64, scratch_operands = 0 : i64, tpu.core_type = #tpu.core_type<tc>, window_params = [{transform_indices = @transform_0, window_bounds = array<i64: 1, 16, 16, 32>}, {pipeline_mode = #tpu.pipeline_mode<synchronous>, transform_indices = @transform_1, window_bounds = array<i64: 1, 32>}, {pipeline_mode = #tpu.pipeline_mode<synchronous>, transform_indices = @transform_2, window_bounds = array<i64: 1, 32>}, {pipeline_mode = #tpu.pipeline_mode<synchronous>, transform_indices = @transform_3, window_bounds = array<i64: 32, 8>}, {pipeline_mode = #tpu.pipeline_mode<synchronous>, transform_indices = @transform_4, window_bounds = array<i64: 1, 8>}, {pipeline_mode = #tpu.pipeline_mode<synchronous>, transform_indices = @transform_5, window_bounds = array<i64: 3, 24, 8>}, {pipeline_mode = #tpu.pipeline_mode<synchronous>, transform_indices = @transform_6, window_bounds = array<i64: 1, 8>}, {pipeline_mode = #tpu.pipeline_mode<synchronous>, transform_indices = @transform_7, window_bounds = array<i64: 8, 32>}, {transform_indices = @transform_8, window_bounds = array<i64: 1, 8, 16, 32>}]} {
    %c8_i32 = arith.constant 8 : i32
    %0 = arith.muli %arg1, %c8_i32 : i32
    %1 = tpu.assume_multiple %0, 8 : i32
    %c1_i32 = arith.constant 1 : i32
    %2 = arith.subi %1, %c1_i32 : i32
    %c0_i32 = arith.constant 0 : i32
    %3 = arith.maxsi %2, %c0_i32 : i32
    %c8_i32_0 = arith.constant 8 : i32
    %4 = arith.addi %1, %c8_i32_0 : i32
    %c15_i32 = arith.constant 15 : i32
    %5 = arith.minsi %4, %c15_i32 : i32
    %c0 = arith.constant 0 : index
    %6 = arith.index_cast %3 : i32 to index
    %c0_1 = arith.constant 0 : index
    %c0_2 = arith.constant 0 : index
    %7 = vector.load %arg2[%c0, %6, %c0_1, %c0_2] : memref<1x16x16x32xbf16, #tpu.memory_space<vmem>>, vector<1x1x16x32xbf16>
    %8 = vector.shape_cast %7 : vector<1x1x16x32xbf16> to vector<1x16x32xbf16>
    %c0_3 = arith.constant 0 : index
    %9 = arith.index_cast %1 : i32 to index
    %c0_4 = arith.constant 0 : index
    %c0_5 = arith.constant 0 : index
    %10 = vector.load %arg2[%c0_3, %9, %c0_4, %c0_5] : memref<1x16x16x32xbf16, #tpu.memory_space<vmem>>, vector<1x8x16x32xbf16>
    %11 = vector.shape_cast %10 : vector<1x8x16x32xbf16> to vector<8x16x32xbf16>
    %c0_6 = arith.constant 0 : index
    %12 = arith.index_cast %5 : i32 to index
    %c0_7 = arith.constant 0 : index
    %c0_8 = arith.constant 0 : index
    %13 = vector.load %arg2[%c0_6, %12, %c0_7, %c0_8] : memref<1x16x16x32xbf16, #tpu.memory_space<vmem>>, vector<1x1x16x32xbf16>
    %14 = vector.shape_cast %13 : vector<1x1x16x32xbf16> to vector<1x16x32xbf16>
    %15 = tpu.concatenate %8, %11, %14 in 0 : vector<1x16x32xbf16>, vector<8x16x32xbf16>, vector<1x16x32xbf16> -> vector<10x16x32xbf16>
    %16 = arith.extf %15 : vector<10x16x32xbf16> to vector<10x16x32xf32>
    %c0_9 = arith.constant 0 : index
    %c0_10 = arith.constant 0 : index
    %17 = vector.load %arg3[%c0_9, %c0_10] : memref<1x32xf32, #tpu.memory_space<vmem>>, vector<1x32xf32>
    %18 = vector.shape_cast %17 : vector<1x32xf32> to vector<1x1x32xf32>
    %19 = vector.broadcast %18 : vector<1x1x32xf32> to vector<10x16x32xf32>
    %20 = arith.mulf %16, %19 : vector<10x16x32xf32>
    %c0_11 = arith.constant 0 : index
    %c0_12 = arith.constant 0 : index
    %21 = vector.load %arg4[%c0_11, %c0_12] : memref<1x32xf32, #tpu.memory_space<vmem>>, vector<1x32xf32>
    %22 = vector.shape_cast %21 : vector<1x32xf32> to vector<1x1x32xf32>
    %23 = vector.broadcast %22 : vector<1x1x32xf32> to vector<10x16x32xf32>
    %24 = arith.addf %20, %23 : vector<10x16x32xf32>
    %cst = arith.constant 0.000000e+00 : f32
    %25 = vector.broadcast %cst : f32 to vector<10x16x32xf32>
    %26 = arith.maximumf %24, %25 : vector<10x16x32xf32>
    %27 = arith.truncf %26 : vector<10x16x32xf32> to vector<10x16x32xbf16>
    %28 = vector.shape_cast %27 : vector<10x16x32xbf16> to vector<160x32xbf16>
    %c0_13 = arith.constant 0 : index
    %c0_14 = arith.constant 0 : index
    %29 = vector.load %arg5[%c0_13, %c0_14] : memref<32x8xbf16, #tpu.memory_space<vmem>>, vector<32x8xbf16>
    %cst_15 = arith.constant dense<0.000000e+00> : vector<160x8xf32>
    %30 = tpu.matmul %28, %29, %cst_15 {dimension_numbers = #tpu.dot_dimension_numbers<[1], [0], [0], [1], [0, 0, 1, 1], [], []>} : vector<160x32xbf16>, vector<32x8xbf16>, vector<160x8xf32> -> vector<160x8xf32>
    %c0_16 = arith.constant 0 : index
    %c0_17 = arith.constant 0 : index
    %31 = vector.load %arg6[%c0_16, %c0_17] : memref<1x8xf32, #tpu.memory_space<vmem>>, vector<1x8xf32>
    %32 = vector.broadcast %31 : vector<1x8xf32> to vector<160x8xf32>
    %33 = arith.addf %30, %32 : vector<160x8xf32>
    %cst_18 = arith.constant 0.000000e+00 : f32
    %34 = vector.broadcast %cst_18 : f32 to vector<160x8xf32>
    %35 = arith.maximumf %33, %34 : vector<160x8xf32>
    %36 = vector.shape_cast %35 : vector<160x8xf32> to vector<10x16x8xf32>
    %37 = tpu.iota {dimensions = array<i32: 0>} : vector<10x1x1xi32>
    %c0_i32_19 = arith.constant 0 : i32
    %38 = vector.broadcast %c0_i32_19 : i32 to vector<10x1x1xi32>
    %39 = arith.cmpi sgt, %37, %38 : vector<10x1x1xi32>
    %c0_i32_20 = arith.constant 0 : i32
    %40 = arith.cmpi sgt, %arg1, %c0_i32_20 : i32
    %41 = vector.broadcast %40 : i1 to vector<10x1x1xi1>
    %42 = arith.ori %39, %41 : vector<10x1x1xi1>
    %c9_i32 = arith.constant 9 : i32
    %43 = vector.broadcast %c9_i32 : i32 to vector<10x1x1xi32>
    %44 = arith.cmpi slt, %37, %43 : vector<10x1x1xi32>
    %c1_i32_21 = arith.constant 1 : i32
    %45 = arith.cmpi slt, %arg1, %c1_i32_21 : i32
    %46 = vector.broadcast %45 : i1 to vector<10x1x1xi1>
    %47 = arith.ori %44, %46 : vector<10x1x1xi1>
    %48 = arith.andi %42, %47 : vector<10x1x1xi1>
    %cst_22 = arith.constant 0.000000e+00 : f32
    %49 = vector.shape_cast %48 : vector<10x1x1xi1> to vector<10x1x1xi1>
    %50 = vector.broadcast %49 : vector<10x1x1xi1> to vector<10x16x8xi1>
    %51 = vector.broadcast %cst_22 : f32 to vector<10x16x8xf32>
    %52 = arith.select %50, %36, %51 : vector<10x16x8xi1>, vector<10x16x8xf32>
    %53 = vector.shape_cast %52 : vector<10x16x8xf32> to vector<160x8xf32>
    %c1_i32_23 = arith.constant 1 : i32
    %54 = tpu.dynamic_rotate %53 by %c1_i32_23 dim 0 : vector<160x8xf32>, i32 -> vector<160x8xf32>
    %55 = vector.shape_cast %54 : vector<160x8xf32> to vector<10x16x8xf32>
    %c159_i32 = arith.constant 159 : i32
    %56 = tpu.dynamic_rotate %53 by %c159_i32 dim 0 : vector<160x8xf32>, i32 -> vector<160x8xf32>
    %57 = vector.shape_cast %56 : vector<160x8xf32> to vector<10x16x8xf32>
    %58 = tpu.iota {dimensions = array<i32: 1>} : vector<1x16x1xi32>
    %59 = arith.truncf %52 : vector<10x16x8xf32> to vector<10x16x8xbf16>
    %c1_i32_24 = arith.constant 1 : i32
    %60 = vector.broadcast %c1_i32_24 : i32 to vector<1x16x1xi32>
    %61 = arith.cmpi sge, %58, %60 : vector<1x16x1xi32>
    %cst_25 = arith.constant 0.000000e+00 : f32
    %62 = vector.shape_cast %61 : vector<1x16x1xi1> to vector<1x16x1xi1>
    %63 = vector.broadcast %62 : vector<1x16x1xi1> to vector<10x16x8xi1>
    %64 = vector.broadcast %cst_25 : f32 to vector<10x16x8xf32>
    %65 = arith.select %63, %55, %64 : vector<10x16x8xi1>, vector<10x16x8xf32>
    %66 = arith.truncf %65 : vector<10x16x8xf32> to vector<10x16x8xbf16>
    %c14_i32 = arith.constant 14 : i32
    %67 = vector.broadcast %c14_i32 : i32 to vector<1x16x1xi32>
    %68 = arith.cmpi sle, %58, %67 : vector<1x16x1xi32>
    %cst_26 = arith.constant 0.000000e+00 : f32
    %69 = vector.shape_cast %68 : vector<1x16x1xi1> to vector<1x16x1xi1>
    %70 = vector.broadcast %69 : vector<1x16x1xi1> to vector<10x16x8xi1>
    %71 = vector.broadcast %cst_26 : f32 to vector<10x16x8xf32>
    %72 = arith.select %70, %57, %71 : vector<10x16x8xi1>, vector<10x16x8xf32>
    %73 = arith.truncf %72 : vector<10x16x8xf32> to vector<10x16x8xbf16>
    %cst_27 = arith.constant 0.000000e+00 : f32
    %74 = vector.broadcast %cst_27 : f32 to vector<128x8xf32>
    %75 = vector.extract_strided_slice %66 {offsets = [0, 0, 0], sizes = [8, 16, 8], strides = [1, 1, 1]} : vector<10x16x8xbf16> to vector<8x16x8xbf16>
    %76 = vector.extract_strided_slice %59 {offsets = [0, 0, 0], sizes = [8, 16, 8], strides = [1, 1, 1]} : vector<10x16x8xbf16> to vector<8x16x8xbf16>
    %77 = vector.extract_strided_slice %73 {offsets = [0, 0, 0], sizes = [8, 16, 8], strides = [1, 1, 1]} : vector<10x16x8xbf16> to vector<8x16x8xbf16>
    %78 = tpu.concatenate %75, %76, %77 in 2 : vector<8x16x8xbf16>, vector<8x16x8xbf16>, vector<8x16x8xbf16> -> vector<8x16x24xbf16>
    %79 = vector.shape_cast %78 : vector<8x16x24xbf16> to vector<128x24xbf16>
    %c0_28 = arith.constant 0 : index
    %c0_29 = arith.constant 0 : index
    %c0_30 = arith.constant 0 : index
    %80 = vector.load %arg7[%c0_28, %c0_29, %c0_30] : memref<3x24x8xbf16, #tpu.memory_space<vmem>>, vector<1x24x8xbf16>
    %81 = vector.shape_cast %80 : vector<1x24x8xbf16> to vector<24x8xbf16>
    %cst_31 = arith.constant dense<0.000000e+00> : vector<128x8xf32>
    %82 = tpu.matmul %79, %81, %cst_31 {dimension_numbers = #tpu.dot_dimension_numbers<[1], [0], [0], [1], [0, 0, 1, 1], [], []>} : vector<128x24xbf16>, vector<24x8xbf16>, vector<128x8xf32> -> vector<128x8xf32>
    %83 = arith.addf %74, %82 : vector<128x8xf32>
    %84 = vector.extract_strided_slice %66 {offsets = [1, 0, 0], sizes = [8, 16, 8], strides = [1, 1, 1]} : vector<10x16x8xbf16> to vector<8x16x8xbf16>
    %85 = vector.extract_strided_slice %59 {offsets = [1, 0, 0], sizes = [8, 16, 8], strides = [1, 1, 1]} : vector<10x16x8xbf16> to vector<8x16x8xbf16>
    %86 = vector.extract_strided_slice %73 {offsets = [1, 0, 0], sizes = [8, 16, 8], strides = [1, 1, 1]} : vector<10x16x8xbf16> to vector<8x16x8xbf16>
    %87 = tpu.concatenate %84, %85, %86 in 2 : vector<8x16x8xbf16>, vector<8x16x8xbf16>, vector<8x16x8xbf16> -> vector<8x16x24xbf16>
    %88 = vector.shape_cast %87 : vector<8x16x24xbf16> to vector<128x24xbf16>
    %c1 = arith.constant 1 : index
    %c0_32 = arith.constant 0 : index
    %c0_33 = arith.constant 0 : index
    %89 = vector.load %arg7[%c1, %c0_32, %c0_33] : memref<3x24x8xbf16, #tpu.memory_space<vmem>>, vector<1x24x8xbf16>
    %90 = vector.shape_cast %89 : vector<1x24x8xbf16> to vector<24x8xbf16>
    %cst_34 = arith.constant dense<0.000000e+00> : vector<128x8xf32>
    %91 = tpu.matmul %88, %90, %cst_34 {dimension_numbers = #tpu.dot_dimension_numbers<[1], [0], [0], [1], [0, 0, 1, 1], [], []>} : vector<128x24xbf16>, vector<24x8xbf16>, vector<128x8xf32> -> vector<128x8xf32>
    %92 = arith.addf %83, %91 : vector<128x8xf32>
    %93 = vector.extract_strided_slice %66 {offsets = [2, 0, 0], sizes = [8, 16, 8], strides = [1, 1, 1]} : vector<10x16x8xbf16> to vector<8x16x8xbf16>
    %94 = vector.extract_strided_slice %59 {offsets = [2, 0, 0], sizes = [8, 16, 8], strides = [1, 1, 1]} : vector<10x16x8xbf16> to vector<8x16x8xbf16>
    %95 = vector.extract_strided_slice %73 {offsets = [2, 0, 0], sizes = [8, 16, 8], strides = [1, 1, 1]} : vector<10x16x8xbf16> to vector<8x16x8xbf16>
    %96 = tpu.concatenate %93, %94, %95 in 2 : vector<8x16x8xbf16>, vector<8x16x8xbf16>, vector<8x16x8xbf16> -> vector<8x16x24xbf16>
    %97 = vector.shape_cast %96 : vector<8x16x24xbf16> to vector<128x24xbf16>
    %c2 = arith.constant 2 : index
    %c0_35 = arith.constant 0 : index
    %c0_36 = arith.constant 0 : index
    %98 = vector.load %arg7[%c2, %c0_35, %c0_36] : memref<3x24x8xbf16, #tpu.memory_space<vmem>>, vector<1x24x8xbf16>
    %99 = vector.shape_cast %98 : vector<1x24x8xbf16> to vector<24x8xbf16>
    %cst_37 = arith.constant dense<0.000000e+00> : vector<128x8xf32>
    %100 = tpu.matmul %97, %99, %cst_37 {dimension_numbers = #tpu.dot_dimension_numbers<[1], [0], [0], [1], [0, 0, 1, 1], [], []>} : vector<128x24xbf16>, vector<24x8xbf16>, vector<128x8xf32> -> vector<128x8xf32>
    %101 = arith.addf %92, %100 : vector<128x8xf32>
    %c0_38 = arith.constant 0 : index
    %c0_39 = arith.constant 0 : index
    %102 = vector.load %arg8[%c0_38, %c0_39] : memref<1x8xf32, #tpu.memory_space<vmem>>, vector<1x8xf32>
    %103 = vector.broadcast %102 : vector<1x8xf32> to vector<128x8xf32>
    %104 = arith.addf %101, %103 : vector<128x8xf32>
    %cst_40 = arith.constant 0.000000e+00 : f32
    %105 = vector.broadcast %cst_40 : f32 to vector<128x8xf32>
    %106 = arith.maximumf %104, %105 : vector<128x8xf32>
    %107 = arith.truncf %106 : vector<128x8xf32> to vector<128x8xbf16>
    %c0_41 = arith.constant 0 : index
    %c0_42 = arith.constant 0 : index
    %108 = vector.load %arg9[%c0_41, %c0_42] : memref<8x32xbf16, #tpu.memory_space<vmem>>, vector<8x32xbf16>
    %cst_43 = arith.constant dense<0.000000e+00> : vector<128x32xf32>
    %109 = tpu.matmul %107, %108, %cst_43 {dimension_numbers = #tpu.dot_dimension_numbers<[1], [0], [0], [1], [0, 0, 1, 1], [], []>} : vector<128x8xbf16>, vector<8x32xbf16>, vector<128x32xf32> -> vector<128x32xf32>
    %c0_44 = arith.constant 0 : index
    %110 = arith.index_cast %1 : i32 to index
    %c0_45 = arith.constant 0 : index
    %c0_46 = arith.constant 0 : index
    %111 = vector.load %arg2[%c0_44, %110, %c0_45, %c0_46] : memref<1x16x16x32xbf16, #tpu.memory_space<vmem>>, vector<1x8x16x32xbf16>
    %112 = vector.shape_cast %111 : vector<1x8x16x32xbf16> to vector<8x16x32xbf16>
    %113 = arith.extf %112 : vector<8x16x32xbf16> to vector<8x16x32xf32>
    %114 = vector.shape_cast %109 : vector<128x32xf32> to vector<8x16x32xf32>
    %115 = arith.addf %114, %113 : vector<8x16x32xf32>
    %116 = arith.truncf %115 : vector<8x16x32xf32> to vector<8x16x32xbf16>
    %c0_47 = arith.constant 0 : index
    %c0_48 = arith.constant 0 : index
    %c0_49 = arith.constant 0 : index
    %c0_50 = arith.constant 0 : index
    %117 = vector.load %arg10[%c0_47, %c0_48, %c0_49, %c0_50] : memref<1x8x16x32xbf16, #tpu.memory_space<vmem>>, vector<1x8x16x32xbf16>
    %118 = vector.shape_cast %117 : vector<1x8x16x32xbf16> to vector<8x16x32xbf16>
    %119 = vector.shape_cast %116 : vector<8x16x32xbf16> to vector<1x8x16x32xbf16>
    tpu.vector_store %arg10[%c0_47, %c0_48, %c0_49, %c0_50], %119 {strides = array<i32>} : memref<1x8x16x32xbf16, #tpu.memory_space<vmem>>, vector<1x8x16x32xbf16>,
    return
  }
  func.func @transform_0(%arg0: i32, %arg1: i32) -> (i32, i32, i32, i32) {
    %c0_i32 = arith.constant 0 : i32
    %c0_i32_0 = arith.constant 0 : i32
    %c0_i32_1 = arith.constant 0 : i32
    %c0_i32_2 = arith.constant 0 : i32
    return %arg0, %c0_i32, %c0_i32_0, %c0_i32_1 : i32, i32, i32, i32
  }
  func.func @transform_1(%arg0: i32, %arg1: i32) -> (i32, i32) {
    %c0_i32 = arith.constant 0 : i32
    %c0_i32_0 = arith.constant 0 : i32
    %c0_i32_1 = arith.constant 0 : i32
    return %c0_i32, %c0_i32_0 : i32, i32
  }
  func.func @transform_2(%arg0: i32, %arg1: i32) -> (i32, i32) {
    %c0_i32 = arith.constant 0 : i32
    %c0_i32_0 = arith.constant 0 : i32
    %c0_i32_1 = arith.constant 0 : i32
    return %c0_i32, %c0_i32_0 : i32, i32
  }
  func.func @transform_3(%arg0: i32, %arg1: i32) -> (i32, i32) {
    %c0_i32 = arith.constant 0 : i32
    %c0_i32_0 = arith.constant 0 : i32
    %c0_i32_1 = arith.constant 0 : i32
    return %c0_i32, %c0_i32_0 : i32, i32
  }
  func.func @transform_4(%arg0: i32, %arg1: i32) -> (i32, i32) {
    %c0_i32 = arith.constant 0 : i32
    %c0_i32_0 = arith.constant 0 : i32
    %c0_i32_1 = arith.constant 0 : i32
    return %c0_i32, %c0_i32_0 : i32, i32
  }
  func.func @transform_5(%arg0: i32, %arg1: i32) -> (i32, i32, i32) {
    %c0_i32 = arith.constant 0 : i32
    %c0_i32_0 = arith.constant 0 : i32
    %c0_i32_1 = arith.constant 0 : i32
    %c0_i32_2 = arith.constant 0 : i32
    return %c0_i32, %c0_i32_0, %c0_i32_1 : i32, i32, i32
  }
  func.func @transform_6(%arg0: i32, %arg1: i32) -> (i32, i32) {
    %c0_i32 = arith.constant 0 : i32
    %c0_i32_0 = arith.constant 0 : i32
    %c0_i32_1 = arith.constant 0 : i32
    return %c0_i32, %c0_i32_0 : i32, i32
  }
  func.func @transform_7(%arg0: i32, %arg1: i32) -> (i32, i32) {
    %c0_i32 = arith.constant 0 : i32
    %c0_i32_0 = arith.constant 0 : i32
    %c0_i32_1 = arith.constant 0 : i32
    return %c0_i32, %c0_i32_0 : i32, i32
  }
  func.func @transform_8(%arg0: i32, %arg1: i32) -> (i32, i32, i32, i32) {
    %c0_i32 = arith.constant 0 : i32
    %c0_i32_0 = arith.constant 0 : i32
    %c0_i32_1 = arith.constant 0 : i32
    return %arg0, %arg1, %c0_i32, %c0_i32_0 : i32, i32, i32, i32
  }
}

</mosaic_0001>

<bundles_post_ra>
// kernel: tpu_custom_call.1
= control target key start
LH: loop header
LB: loop body
LE: loop exit
PB: predicated region body
PF: predicated region fallthrough
CT: control target
= control target key end

     0   :  { %s3009_s0 = inlined_call_operand.hbm [shape: bf16[2,16,16,32], index: 0, kind: input, shape index: {}]   ;;  %s3010_s1 = inlined_call_operand.vmem [shape: f32[1,32], index: 1, kind: input, shape index: {}]   ;;  %s3011_s2 = inlined_call_operand.vmem [shape: f32[1,32], index: 2, kind: input, shape index: {}]   ;;  %s3012_s3 = inlined_call_operand.vmem [shape: bf16[32,8], index: 3, kind: input, shape index: {}]   ;;  %s3013_s4 = inlined_call_operand.vmem [shape: f32[1,8], index: 4, kind: input, shape index: {}]   ;;  %s3014_s5 = inlined_call_operand.vmem [shape: bf16[3,24,8], index: 5, kind: input, shape index: {}]   ;;  %s3015_s6 = inlined_call_operand.vmem [shape: f32[1,8], index: 6, kind: input, shape index: {}]   ;;  %s3016_s7 = inlined_call_operand.vmem [shape: bf16[8,32], index: 7, kind: input, shape index: {}]   ;;  %s3017_s8 = inlined_call_operand.hbm [shape: bf16[2,16,16,32], index: 8, kind: output, shape index: {}]  }
   0x1   :  { %3043 = sst [smem:[#allocation16_spill]] %s3017_s8 }
   0x2   :  { %13 = vsyncpa [#allocation3], 0 }
   0x3   :  { %15 = vsyncpa [#allocation3 + $0x1], 0 }
   0x4   :  { %16 = vsyncpa [#allocation4], 0 }
   0x5   :  { %18 = vsyncpa [#allocation4 + $0x1], 0  ;;  %s2123_s27 = smov 0   ;;  %s2125_s28 = smov 0  }
   0x6   :  { %s2127_s29 = smov 0   ;;  %s2129_s30 = smov 0  }
   0x7   :  { %s2131_s9 = smov 0   ;;  %s2133_s10 = smov 0  }
   0x8   :  { %s2135_s11 = smov 0   ;;  %s2137_s12 = smov 0  }
   0x9   :  { %s2139_s13 = smov 0   ;;  %s2141_s14 = smov 0  }
   0xa   :  { %s2143_s15 = smov 0  }
   0xb LB: > { %3044 = sst [smem:[#allocation8_spill]] %s2058_s12  ;;  %s1651_s16 = sadd.s32 4294967295, %s2070_s15   ;;  %s2070_s15 = sphi %s2143_s15, %s24_s15   ;;  %s2066_s14 = sphi %s2141_s14, %s3096_s14   ;;  %s2062_s13 = sphi %s2139_s13, %s3095_s13   ;;  %s2058_s12 = sphi %s2137_s12, %s3094_s12   ;;  %s2054_s11 = sphi %s2135_s11, %s3103_s11   ;;  %s2050_s10 = sphi %s2133_s10, %s3102_s10   ;;  %s2046_s9 = sphi %s2131_s9, %s3101_s9   ;;  %s2042_s30 = sphi %s2129_s30, %s3100_s30   ;;  %s2038_s29 = sphi %s2127_s29, %s3099_s29   ;;  %s2034_s28 = sphi %s2125_s28, %s3098_s28   ;;  %s2030_s27 = sphi %s2123_s27, %s3097_s27  }
   0xc   : > { %3045 = sst [smem:[#allocation9_spill]] %s2062_s13  ;;  %s1652_s17 = sadd.s32 4294967294, %s2070_s15  }
   0xd   : > { %3046 = sst [smem:[#allocation10_spill]] %s2066_s14  ;;  %s33_s18 = sadd.s32 1, %s2062_s13 }
   0xe   : > { %s36_s19 = sadd.s32 1, %s2066_s14  ;;  %p34_p0 = scmp.ge.s32.totalorder %s33_s18, 2 }
   0xf   : > { %s43_s20 = sadd.s32 1, %s2050_s10  ;;  %p50_p1 = scmp.ne.s32.totalorder %s2050_s10, %s2046_s9 }
  0x10   : > { %p51_p2 = scmp.eq.s32.totalorder %s2070_s15, 0  ;;  %s3105_s18 = smov (%p34_p0, %s33_s18), 0 }
  0x11   : > { %3047 = sst [smem:[#allocation11_spill]] %s3105_s18  ;;  %s3107_s19 = smov (!%p34_p0, %s36_s19), %s2066_s14 }
  0x12   : > { %p2187_p3 = por %p51_p2, %p50_p1  ;;  %p56_p4 = scmp.ne.s32.totalorder %s2046_s9, %s2042_s30 }
  0x13   : > { %p38_p5 = scmp.ge.s32.totalorder %s3107_s19, 2  ;;  %p57_p6 = scmp.eq.s32.totalorder %s1651_s16, 0 }
  0x14   : > { %s214_s22 = ssub.s32 %s2062_s13, %s3105_s18  ;;  %s218_s23 = sadd.s32 1, %s2038_s29 }
  0x15   : > { %s3109_s19 = smov (%p38_p5, %s3107_s19), 0  ;;  %p2197_p7 = por %p57_p6, %p56_p4 }
  0x16   : > { %3049 = sst [smem:[#allocation12_spill]] %s3109_s19  ;;  %p228_p8 = scmp.ne.s32.totalorder %s2038_s29, %s2034_s28 }
  0x17   : > { %s40_s25 = ssub.s32 %s2066_s14, %s3109_s19  ;;  %p229_p9 = scmp.eq.s32.totalorder %s1651_s16, 3 }
  0x18   : > { %p41_p10 = scmp.eq.s32.totalorder %s40_s25, 0  ;;  %s215_s26 = sor.u32 %s214_s22, %s40_s25 }
  0x19   : > { %p216_p11 = scmp.eq.s32.totalorder %s215_s26, 0  ;;  %p2205_p12 = por %p229_p9, %p228_p8 }
  0x1a   : > { %s2210_s18 = scalar_select %p41_p10, %s2050_s10, %s43_s20  }
  0x1b   : > { %s3051_s30 = scalar_select %p2205_p12, 1, 0 }
  0x1c   : > { %3053 = sst [smem:[#allocation14_spill]] %s2210_s18  ;;  %p234_p13 = scmp.ne.s32.totalorder %s2034_s28, %s2030_s27 }
  0x1d   : > { %3052 = sst [smem:[#allocation13_spill]] %s3051_s30  ;;  %p235_p0 = scmp.eq.s32.totalorder %s1652_s17, 3 }
  0x1e   : > { %s2213_s13 = scalar_select %p216_p11, %s2038_s29, %s218_s23  }
  0x1f   : > { %p1818_p1 = scmp.lt.s32.totalorder %s2070_s15, 4  ;;  %p2218_p2 = por %p235_p0, %p234_p13 }
  0x20   : > { %3054 = sst [smem:[#allocation15_spill]] %s2213_s13  ;;  %s276_s16 = sand.u32 1, %s2050_s10  }
  0x21   : > { %s1655_s22 = sshll.u32 %s276_s16, 7  ;;  %s1744_s25 = sshll.u32 %s2066_s14, 7 }
  0x22   : > { %s285_s30 = scalar_lea.hbm %s3009_s0, %s1744_s25  ;;  %s280_s20 = scalar_lea.vmem [#allocation2], %s1655_s22 }
  0x23   : > { %s288_s18 = sshll.u32 %s280_s20, 4  ;;  %s286_s12 = sshll.u32 %s285_s30, 4  ;;  %s289_s18 = int_to_ptr.vmem [resolvable:$true] %s288_s18  ;;  %s287_s12 = int_to_ptr.hbm [resolvable:$true] %s286_s12 }
  0x24   : > { %p1811_p4 = pnand %p1818_p1, %p2187_p3  ;;  %p1658_p5 = scmp.ge.s32.totalorder %s2070_s15, 1 }
  0x25   : > { %s277_s17 = scalar_lea.sflag [#allocation3], %s276_s16  ;;  %s2072_s23 = smov 64  }
  0x26   : > { %s2073_s13 = smov 4   ;;  %p296_p6 = scmp.lt.s32.totalorder %s2070_s15, 5 }
  0x27   : > { %1813 = dma.hbm_to_vmem [thread:$0]  (!%p1811_p4), %s287_s12, 2048, %s289_s18, %s277_s17, %s2072_s23, %s2072_s23, %s2073_s13  }
  0x28   : > { %p297_p8 = pnand %p1658_p5, %p296_p6 }
  0x29   : > { %s302_s14 = sand.u32 (!%p297_p8), 1, %s2046_s9  }
  0x2a   : > { %300 = sbr.rel (%p297_p8) target bundleno = 890 (0x37a), region = 52  ;;  %s1659_s19 = sshll.u32 (!%p297_p8), %s302_s14, 7 }
  0x2b   : > { %s303_s25 = scalar_lea.sflag (!%p297_p8), [#allocation3], %s302_s14  ;;  %s2232_s22 = scalar_lea.vmem (!%p297_p8), [#allocation2], %s1659_s19 }
  0x2f   : > { %2021 = dma.done.wait (%p2197_p7), %s303_s25, 2048  }
  0x30   : > { %2023 = vsyncadd (%p2197_p7), %s303_s25, 4294965248  ;;  %s1661_s12 = sshll.u32 %s2054_s11, 3  ;;  %s1747_s18 = sshll.u32 %s2054_s11, 6  ;;  %v1750_v0 = vld [vmem:[%s3012_s3 + $0x8] sm:$0xff]  ;;  %v2252_v2 = vld [vmem:[%s3010_s1] ss:$0 sm:$0xff] }
  0x31   : > { %s1662_s13 = sadd.s32 4294967295, %s1661_s12  ;;  %s2243_s14 = scalar_lea.vmem %s2232_s22, %s1747_s18 [#allocation2]  ;;  %593 = vmatpush.bf16.msra.mxu0 %v1750_v0  ;;  %v1749_v3 = vld [vmem:[%s3012_s3] sm:$0xff]  ;;  %vm556_vm0 = vcmask 261120   ;;  %vm1146_vm7 = vcmask 1043456   ;;  %vm1047_vm8 = vcmask 64512   ;;  %vm1072_vm9 = vcmask 130048  }
  0x32   : > { %p344_p3 = scmp.gt.s32.totalorder %s1662_s13, 0  ;;  %v2260_v6 = vld [vmem:[%s3011_s2] ss:$0 sm:$0xff]  ;;  %v2281_v27 = vld [vmem:[%s2243_s14 + $0x8] sm:$0xff]   ;;  %v2295_v41 = vld [vmem:[%s2243_s14 + $0x10] sm:$0xff]   ;;  %p666_p9 = scmp.gt.s32.totalorder %s2054_s11, 0 }
  0x33   : > { %v2263_v7 = vld [vmem:[%s2243_s14] sm:$0xff]   ;;  %v3038_v30 = vunpack.c.l.bf16 %v2281_v27  ;;  %v3037_v31 = vunpack.c.h.bf16 %v2281_v27  ;;  %v3036_v44 = vunpack.c.l.bf16 %v2295_v41  ;;  %v3035_v45 = vunpack.c.h.bf16 %v2295_v41  ;;  %v2309_v55 = vld [vmem:[%s2243_s14 + $0x18] sm:$0xff]   ;;  %s2074_s30 = smov 8   ;;  %s2075_s16 = smov 16  }
  0x34   : > { %s3111_s13 = smov (!%p344_p3, %s1662_s13), 0  ;;  %v3040_v10 = vunpack.c.l.bf16 %v2263_v7  ;;  %v3039_v11 = vunpack.c.h.bf16 %v2263_v7  ;;  %v3034_v58 = vunpack.c.l.bf16 %v2309_v55  ;;  %v3033_v59 = vunpack.c.h.bf16 %v2309_v55  ;;  %p670_p10 = scmp.lt.s32.totalorder %s2054_s11, 1 }
  0x35   : > { %s1745_s21 = sshll.u32 %s3111_s13, 3  ;;  %594 = vmatpush.bf16.msra.mxu0 %v1749_v3  ;;  %v406_v34 = vmul.f32 %v2252_v2, %v3038_v30  ;;  %v407_v35 = vmul.f32 %v2252_v2, %v3037_v31  ;;  %v408_v48 = vmul.f32 %v2252_v2, %v3036_v44  ;;  %v409_v49 = vmul.f32 %v2252_v2, %v3035_v45  ;;  %s346_s13 = sadd.s32 8, %s1661_s12 }
  0x36   : > { %s351_s24 = scalar_lea.vmem %s2232_s22, %s1745_s21 [#allocation2]  ;;  %v404_v16 = vmul.f32 %v2252_v2, %v3040_v10  ;;  %v405_v17 = vmul.f32 %v2252_v2, %v3039_v11  ;;  %v410_v62 = vmul.f32 %v2252_v2, %v3034_v58  ;;  %v411_v63 = vmul.f32 %v2252_v2, %v3033_v59  ;;  %p347_p7 = scmp.lt.s32.totalorder %s346_s13, 15 }
  0x37   : > { %v1756_v1 = vld [vmem:[%s351_s24] sm:$0xff]   ;;  %v430_v37 = vadd.f32 %v2260_v6, %v406_v34  ;;  %v431_v38 = vadd.f32 %v2260_v6, %v407_v35  ;;  %v432_v51 = vadd.f32 %v2260_v6, %v408_v48  ;;  %v433_v52 = vadd.f32 %v2260_v6, %v409_v49  ;;  %s671_s24 = scalar_select %p670_p10, 1, 0 }
  0x38   : > { %v1757_v4 = vunpack.c.l.bf16 %v1756_v1  ;;  %v1758_v5 = vunpack.c.h.bf16 %v1756_v1  ;;  %v428_v22 = vadd.f32 %v2260_v6, %v404_v16  ;;  %v429_v23 = vadd.f32 %v2260_v6, %v405_v17  ;;  %s3113_s13 = smov (!%p347_p7, %s346_s13), 15  ;;  %s337_s20 = sand.u32 1, %s2034_s28  }
  0x39   : > { %v450_v39 = vmax.f32 %v430_v37, 0.0  ;;  %v451_v40 = vmax.f32 %v431_v38, 0.0  ;;  %v452_v53 = vmax.f32 %v432_v51, 0.0  ;;  %v453_v54 = vmax.f32 %v433_v52, 0.0  ;;  %s1748_s12 = sshll.u32 %s3113_s13, 3  ;;  %s1660_s17 = sshll.u32 %s337_s20, 6 }
  0x3a   : > { %v402_v8 = vmul.f32 %v2252_v2, %v1757_v4  ;;  %v403_v9 = vmul.f32 %v2252_v2, %v1758_v5  ;;  %v448_v25 = vmax.f32 %v428_v22, 0.0  ;;  %v449_v26 = vmax.f32 %v429_v23, 0.0  ;;  %s375_s18 = scalar_lea.vmem %s2232_s22, %s1748_s12 [#allocation2]  ;;  %s2890_s23 = scalar_lea.vmem [#allocation5], %s1660_s17 }
  0x3b   : > { %v470_v42 = vpack.c.bf16 %v450_v39, %v450_v39  ;;  %v471_v43 = vpack.c.bf16 %v451_v40, %v451_v40  ;;  %v472_v56 = vpack.c.bf16 %v452_v53, %v452_v53  ;;  %v473_v57 = vpack.c.bf16 %v453_v54, %v453_v54  ;;  %s667_s22 = scalar_select %p666_p9, 1, 0 }
  0x3c   : > { %v426_v12 = vadd.f32 %v2260_v6, %v402_v8  ;;  %v427_v13 = vadd.f32 %v2260_v6, %v403_v9  ;;  %v468_v28 = vpack.c.bf16 %v448_v25, %v448_v25  ;;  %v469_v29 = vpack.c.bf16 %v449_v26, %v449_v26  ;;  %v2323_v8 = vld [vmem:[%s2243_s14 + $0x20] sm:$0xff]   ;;  %s3083_s19 = sld [smem:[#allocation8_spill]]  ;;  %s1754_s25 = sshll.u32 %s2054_s11, 4 }
  0x3d   : > { %v518_v46 = vunpack.c.l.b16 %v470_v42  ;;  %v519_v47 = vunpack.c.l.b16 %v471_v43  ;;  %v520_v60 = vunpack.c.l.b16 %v472_v56  ;;  %v521_v61 = vunpack.c.l.b16 %v473_v57  ;;  %v2351_v42 = vld [vmem:[%s2243_s14 + $0x30] sm:$0xff]   ;;  %s1555_s11 = sshll.u32 %s2890_s23, 4  ;;  %s1540_s26 = scalar_lea.sflag [#allocation4], %s337_s20  ;;  %s1556_s11 = int_to_ptr.vmem [resolvable:$true] %s1555_s11 }
  0x3e   : > { %v446_v14 = vmax.f32 %v426_v12, 0.0  ;;  %v447_v15 = vmax.f32 %v427_v13, 0.0  ;;  %v516_v32 = vunpack.c.l.b16 %v468_v28  ;;  %v517_v33 = vunpack.c.l.b16 %v469_v29 }
  0x3f   : > { %v536_v50 = vpack.c.b16 %v519_v47, %v518_v46  ;;  %v537_v0 = vpack.c.b16 %v521_v61, %v520_v60  ;;  %v434_v1 = vadd.f32 %v2260_v6, %v410_v62  ;;  %v435_v3 = vadd.f32 %v2260_v6, %v411_v63  ;;  %v2367_v61 = vld [vmem:[%s2243_s14 + $0x38] sm:$0xff]  }
  0x40   : > { %v466_v18 = vpack.c.bf16 %v446_v14, %v446_v14  ;;  %v467_v19 = vpack.c.bf16 %v447_v15, %v447_v15  ;;  %v535_v36 = vpack.c.b16 %v517_v33, %v516_v32  ;;  %v3032_v13 = vunpack.c.l.bf16 %v2323_v8 }
  0x41   : > { %v454_v4 = vmax.f32 %v434_v1, 0.0  ;;  %v455_v5 = vmax.f32 %v435_v3, 0.0  ;;  %v3031_v14 = vunpack.c.h.bf16 %v2323_v8  ;;  %v3028_v47 = vunpack.c.l.bf16 %v2351_v42 }
  0x42   : > { %v514_v20 = vunpack.c.l.b16 %v466_v18  ;;  %v515_v21 = vunpack.c.l.b16 %v467_v19  ;;  %v412_v17 = vmul.f32 %v2252_v2, %v3032_v13  ;;  %v3027_v48 = vunpack.c.h.bf16 %v2351_v42  ;;  %s1740_s13 = sshll.u32 %s3083_s19, 5 }
  0x43   : > { %v474_v9 = vpack.c.bf16 %v454_v4, %v454_v4  ;;  %v475_v12 = vpack.c.bf16 %v455_v5, %v455_v5  ;;  %v413_v18 = vmul.f32 %v2252_v2, %v3031_v14  ;;  %v416_v51 = vmul.f32 %v2252_v2, %v3028_v47  ;;  %s1552_s12 = sadd.s32 %s1754_s25, %s1740_s13 }
  0x44   : > { %v534_v24 = vpack.c.b16 %v515_v21, %v514_v20  ;;  %v436_v20 = vadd.f32 %v2260_v6, %v412_v17  ;;  %v417_v52 = vmul.f32 %v2252_v2, %v3027_v48  ;;  %v3025_v1 = vunpack.c.h.bf16 %v2367_v61 }
  0x45   : > { %v522_v15 = vunpack.c.l.b16 %v474_v9  ;;  %v523_v16 = vunpack.c.l.b16 %v475_v12  ;;  %v437_v21 = vadd.f32 %v2260_v6, %v413_v18  ;;  %v440_v54 = vadd.f32 %v2260_v6, %v416_v51 }
  0x46   : > { %1677 = vmatmul.msk.bf16.vlgmr.msra.gmra.mxu0 %vm556_vm0, %v534_v24  ;;  %v456_v22 = vmax.f32 %v436_v20, 0.0  ;;  %v2337_v24 = vld [vmem:[%s2243_s14 + $0x28] sm:$0xff]   ;;  %v441_v56 = vadd.f32 %v2260_v6, %v417_v52  ;;  %v419_v9 = vmul.f32 %v2252_v2, %v3025_v1  ;;  %vm1129_vm10 = vcmask 195584  }
  0x47   : > { %v538_v19 = vpack.c.b16 %v523_v16, %v522_v15  ;;  %v457_v23 = vmax.f32 %v437_v21, 0.0  ;;  %v3030_v28 = vunpack.c.l.bf16 %v2337_v24  ;;  %v3029_v29 = vunpack.c.h.bf16 %v2337_v24 }
  0x48   : > { %v476_v25 = vpack.c.bf16 %v456_v22, %v456_v22  ;;  %v460_v57 = vmax.f32 %v440_v54, 0.0  ;;  %v461_v60 = vmax.f32 %v441_v56, 0.0  ;;  %v443_v16 = vadd.f32 %v2260_v6, %v419_v9 }
  0x49   : > { %v477_v26 = vpack.c.bf16 %v457_v23, %v457_v23  ;;  %v414_v34 = vmul.f32 %v2252_v2, %v3030_v28  ;;  %v415_v35 = vmul.f32 %v2252_v2, %v3029_v29  ;;  %vm1522_vm11 = vcmask 257024  }
  0x4a   : > { %v524_v32 = vunpack.c.l.b16 %v476_v25  ;;  %v480_v62 = vpack.c.bf16 %v460_v57, %v460_v57  ;;  %v481_v63 = vpack.c.bf16 %v461_v60, %v461_v60  ;;  %v463_v18 = vmax.f32 %v443_v16, 0.0 }
  0x4b   : > { %v525_v33 = vunpack.c.l.b16 %v477_v26  ;;  %v438_v37 = vadd.f32 %v2260_v6, %v414_v34  ;;  %v439_v38 = vadd.f32 %v2260_v6, %v415_v35  ;;  %v2387_v34 = vld [vmem:[%s3013_s4] ss:$0 sm:$0xff] }
  0x4c   : > { %v528_v3 = vunpack.c.l.b16 %v480_v62  ;;  %v529_v4 = vunpack.c.l.b16 %v481_v63  ;;  %v483_v21 = vpack.c.bf16 %v463_v18, %v463_v18 }
  0x4d   : > { %v458_v39 = vmax.f32 %v438_v37, 0.0  ;;  %v459_v40 = vmax.f32 %v439_v38, 0.0 }
  0x4e   : > { %v541_v12 = vpack.c.b16 %v529_v4, %v528_v3  ;;  %v531_v26 = vunpack.c.l.b16 %v483_v21 }
  0x4f   : > { %v478_v43 = vpack.c.bf16 %v458_v39, %v458_v39  ;;  %v479_v46 = vpack.c.bf16 %v459_v40, %v459_v40  ;;  %v668_v40 = vstv %s667_s22  ;;  %s3088_s22 = sld [smem:[#allocation16_spill]] }
  0x50   : > { %vm669_vm1 = vcmp.eq.s32.totalorder %v668_v40, 1 }
  0x51   : > { %v526_v49 = vunpack.c.l.b16 %v478_v43 }
  0x56   : > { %1678 = vmatmul.msk.bf16.gmra.mxu0 %vm556_vm0, %v535_v36  ;;  %v539_v36 = vpack.c.b16 %v525_v33, %v524_v32 }
  0x66   : > { %1679 = vmatmul.msk.bf16.gmra.mxu0 %vm556_vm0, %v536_v50  ;;  %v527_v50 = vunpack.c.l.b16 %v479_v46 }
  0x68   : > { %v540_v53 = vpack.c.b16 %v527_v50, %v526_v49  ;;  %v718_v49 = vlaneseq }
  0x6a   : > { %v2396_v56 = vshrl.u32 %v718_v49, 7 }
  0x6c   : > { %vm720_vm2 = vcmp.lt.s32.totalorder %v2396_v56, 1  ;;  %vm761_vm3 = vcmp.lt.s32.totalorder %v2396_v56, 7  ;;  %vm803_vm5 = vcmp.ge.s32.totalorder %v2396_v56, 1 }
  0x76   : > { %1680 = vmatmul.msk.bf16.gmra.mxu0 %vm556_vm0, %v537_v0  ;;  %v3026_v0 = vunpack.c.l.bf16 %v2367_v61 }
  0x78   : > { %v418_v5 = vmul.f32 %v2252_v2, %v3026_v0 }
  0x7a   : > { %v442_v15 = vadd.f32 %v2260_v6, %v418_v5 }
  0x7c   : > { %v462_v17 = vmax.f32 %v442_v15, 0.0 }
  0x7e   : > { %v482_v20 = vpack.c.bf16 %v462_v17, %v462_v17 }
  0x80   : > { %v530_v25 = vunpack.c.l.b16 %v482_v20 }
  0x82   : > { %v542_v35 = vpack.c.b16 %v531_v26, %v530_v25 }
  0x86   : > { %1681 = vmatmul.msk.bf16.gmra.mxu0 %vm556_vm0, %v538_v19  ;;  %v1792_v19 = vld [vmem:[%s375_s18] sm:$0xff]   ;;  %s1741_s18 = sshll.u32 %s1552_s12, 2  ;;  %s1968_s12 = scalar_lea.hbm %s3088_s22, 256 }
  0x87   : > { %v1793_v22 = vunpack.c.l.bf16 %v1792_v19  ;;  %v1794_v23 = vunpack.c.h.bf16 %v1792_v19 }
  0x89   : > { %v420_v32 = vmul.f32 %v2252_v2, %v1793_v22  ;;  %v421_v33 = vmul.f32 %v2252_v2, %v1794_v23  ;;  %v2420_v22 = vadd.s32 8, %v2396_v56 }
  0x8b   : > { %v445_v37 = vadd.f32 %v2260_v6, %v421_v33  ;;  %vm850_vm4 = vcmp.le.s32.totalorder %v2420_v22, 14 }
  0x8d   : > { %v465_v46 = vmax.f32 %v445_v37, 0.0 }
  0x8f   : > { %v485_v51 = vpack.c.bf16 %v465_v46, %v465_v46 }
  0x91   : > { %v533_v60 = vunpack.c.l.b16 %v485_v51 }
  0x96   : > { %1682 = vmatmul.msk.bf16.gmra.mxu0 %vm556_vm0, %v539_v36  ;;  %v444_v36 = vadd.f32 %v2260_v6, %v420_v32 }
  0x98   : > { %v464_v43 = vmax.f32 %v444_v36, 0.0 }
  0x9a   : > { %v484_v50 = vpack.c.bf16 %v464_v43, %v464_v43 }
  0x9c   : > { %v532_v57 = vunpack.c.l.b16 %v484_v50 }
  0x9e   : > { %v543_v15 = vpack.c.b16 %v533_v60, %v532_v57 }
  0xa6   : > { %1683 = vmatmul.msk.bf16.gmra.mxu0 %vm556_vm0, %v540_v53 }
  0xb6   : > { %1684 = vmatmul.msk.bf16.gmra.mxu0 %vm556_vm0, %v541_v12 }
  0xc3   : > { %v596_v38 = vpop.f32.mrf.mxu0 }
  0xc4   : > { %v597_v39 = vadd.f32 %v2387_v34, %v596_v38 }
  0xc6   : > { %1685 = vmatmul.msk.bf16.gmra.mxu0 %vm556_vm0, %v542_v35  ;;  %v646_v2 = vmax.f32 %v597_v39, 0.0 }
  0xc8   : > { %v2393_v53 = vsel %vm669_vm1, %v646_v2, 0.0 }
  0xc9   : > { %v783_v62 = vpack.c.bf16 %v2393_v53, %v2393_v53  ;;  %v3042_v63 = vrot.slane %v2393_v53, 7  ;;  %v3041_v4 = vrot.slane %v2393_v53, 1 }
  0xcb   : > { %v598_v52 = vpop.f32.mrf.mxu0  ;;  %v2404_v16 = vunpack.c.l.b16 %v783_v62 }
  0xcc   : > { %v599_v54 = vadd.f32 %v2387_v34, %v598_v52 }
  0xce   : > { %v647_v6 = vmax.f32 %v599_v54, 0.0 }
  0xd0   : > { %v679_v3 = vsel %vm669_vm1, %v647_v6, 0.0 }
  0xd1   : > { %v699_v5 = vrot.slane %v679_v3, 7  ;;  %v742_v9 = vrot.slane %v679_v3, 1  ;;  %v784_v12 = vpack.c.bf16 %v679_v3, %v679_v3 }
  0xd3   : > { %v2406_v17 = vunpack.c.l.b16 %v784_v12  ;;  %v601_v18 = vpop.f32.mrf.mxu0  ;;  %v780_v19 = vsel %vm761_vm3, %v3041_v4, %v742_v9  ;;  %v2416_v20 = vsel %vm720_vm2, %v3042_v63, %v699_v5 }
  0xd4   : > { %v602_v21 = vadd.f32 %v2387_v34, %v601_v18  ;;  %v875_v33 = vpack.c.bf16 %v780_v19, %v780_v19 }
  0xd5   : > { %v967_v23 = vpack.c.b16 %v2406_v17, %v2404_v16 }
  0xd6   : > { %v648_v25 = vmax.f32 %v602_v21, 0.0  ;;  %1686 = vmatmul.msk.bf16.gmra.mxu0 %vm556_vm0, %v543_v15  ;;  %v2434_v43 = vunpack.c.l.b16 %v875_v33 }
  0xd8   : > { %v700_v26 = vrot.slane %v648_v25, 7  ;;  %v743_v32 = vrot.slane %v648_v25, 1  ;;  %v785_v46 = vpack.c.bf16 %v648_v25, %v648_v25 }
  0xda   : > { %v779_v35 = vsel %vm761_vm3, %v742_v9, %v743_v32  ;;  %v738_v36 = vsel %vm720_vm2, %v699_v5, %v700_v26  ;;  %v2442_v60 = vunpack.c.l.b16 %v785_v46 }
  0xdb   : > { %v603_v37 = vpop.f32.mrf.mxu0  ;;  %v856_v38 = vsel %vm850_vm4, %v779_v35, 0.0  ;;  %v811_v50 = vsel %vm803_vm5, %v738_v36, 0.0 }
  0xdc   : > { %v604_v39 = vadd.f32 %v2387_v34, %v603_v37  ;;  %v876_v40 = vpack.c.bf16 %v856_v38, %v856_v38  ;;  %v831_v57 = vpack.c.bf16 %v811_v50, %v811_v50 }
  0xde   : > { %v649_v2 = vmax.f32 %v604_v39, 0.0  ;;  %v2436_v49 = vunpack.c.l.b16 %v876_v40  ;;  %v2453_v19 = vunpack.c.l.b16 %v831_v57 }
  0xe0   : > { %v701_v51 = vrot.slane %v649_v2, 7  ;;  %v744_v52 = vrot.slane %v649_v2, 1  ;;  %v786_v54 = vpack.c.bf16 %v649_v2, %v649_v2 }
  0xe2   : > { %v2444_v62 = vunpack.c.l.b16 %v786_v54  ;;  %v778_v3 = vsel %vm761_vm3, %v743_v32, %v744_v52  ;;  %v737_v5 = vsel %vm720_vm2, %v700_v26, %v701_v51 }
  0xe3   : > { %v606_v9 = vpop.f32.mrf.mxu0  ;;  %v832_v12 = vpack.c.bf16 %v737_v5, %v737_v5  ;;  %v877_v36 = vpack.c.bf16 %v778_v3, %v778_v3 }
  0xe4   : > { %v607_v15 = vadd.f32 %v2387_v34, %v606_v9 }
  0xe5   : > { %v2455_v21 = vunpack.c.l.b16 %v832_v12  ;;  %v2466_v2 = vunpack.c.l.b16 %v877_v36 }
  0xe6   : > { %v650_v25 = vmax.f32 %v607_v15, 0.0 }
  0xe8   : > { %v702_v35 = vrot.slane %v650_v25, 7  ;;  %v745_v32 = vrot.slane %v650_v25, 1  ;;  %v787_v50 = vpack.c.bf16 %v650_v25, %v650_v25 }
  0xea   : > { %v777_v26 = vsel %vm761_vm3, %v744_v52, %v745_v32  ;;  %v736_v37 = vsel %vm720_vm2, %v701_v51, %v702_v35 }
  0xeb   : > { %v608_v38 = vpop.f32.mrf.mxu0  ;;  %v858_v39 = vsel %vm850_vm4, %v777_v26, 0.0  ;;  %v813_v3 = vsel %vm803_vm5, %v736_v37, 0.0  ;;  %v2476_v26 = vunpack.c.l.b16 %v787_v50 }
  0xec   : > { %v609_v40 = vadd.f32 %v2387_v34, %v608_v38  ;;  %v878_v46 = vpack.c.bf16 %v858_v39, %v858_v39  ;;  %v833_v12 = vpack.c.bf16 %v813_v3, %v813_v3 }
  0xee   : > { %v651_v54 = vmax.f32 %v609_v40, 0.0  ;;  %v2468_v57 = vunpack.c.l.b16 %v878_v46  ;;  %v2485_v46 = vunpack.c.l.b16 %v833_v12 }
  0xf0   : > { %v703_v52 = vrot.slane %v651_v54, 7  ;;  %v746_v5 = vrot.slane %v651_v54, 1  ;;  %v788_v9 = vpack.c.bf16 %v651_v54, %v651_v54 }
  0xf2   : > { %v776_v15 = vsel %vm761_vm3, %v745_v32, %v746_v5  ;;  %v2478_v36 = vunpack.c.l.b16 %v788_v9  ;;  %v735_v25 = vsel %vm720_vm2, %v702_v35, %v703_v52 }
  0xf3   : > { %v611_v38 = vpop.f32.mrf.mxu0  ;;  %v834_v39 = vpack.c.bf16 %v735_v25, %v735_v25  ;;  %v879_v1 = vpack.c.bf16 %v776_v15, %v776_v15 }
  0xf4   : > { %v612_v37 = vadd.f32 %v2387_v34, %v611_v38 }
  0xf5   : > { %v2487_v54 = vunpack.c.l.b16 %v834_v39 }
  0xf6   : > { %v652_v3 = vmax.f32 %v612_v37, 0.0  ;;  %v2498_v37 = vunpack.c.l.b16 %v879_v1 }
  0xf8   : > { %v704_v50 = vrot.slane %v652_v3, 7  ;;  %v747_v9 = vrot.slane %v652_v3, 1  ;;  %v789_v48 = vpack.c.bf16 %v652_v3, %v652_v3 }
  0xfa   : > { %v775_v35 = vsel %vm761_vm3, %v746_v5, %v747_v9  ;;  %v734_v25 = vsel %vm720_vm2, %v703_v52, %v704_v50 }
  0xfb   : > { %v613_v38 = vpop.f32.mrf.mxu0  ;;  %v860_v12 = vsel %vm850_vm4, %v775_v35, 0.0  ;;  %v815_v15 = vsel %vm803_vm5, %v734_v25, 0.0  ;;  %v2506_v35 = vunpack.c.l.b16 %v789_v48 }
  0xfc   : > { %v614_v39 = vadd.f32 %v2387_v34, %v613_v38  ;;  %v880_v0 = vpack.c.bf16 %v860_v12, %v860_v12  ;;  %v835_v13 = vpack.c.bf16 %v815_v15, %v815_v15 }
  0xfe   : > { %v653_v47 = vmax.f32 %v614_v39, 0.0  ;;  %v2500_v29 = vunpack.c.l.b16 %v880_v0  ;;  %v2517_v39 = vunpack.c.l.b16 %v835_v13 }
 0x100   : > { %v705_v5 = vrot.slane %v653_v47, 7  ;;  %v748_v28 = vrot.slane %v653_v47, 1  ;;  %v790_v14 = vpack.c.bf16 %v653_v47, %v653_v47  ;;  %v1025_v52 = vpack.c.b16 %v2500_v29, %v2498_v37 }
 0x102   : > { %v2508_v38 = vunpack.c.l.b16 %v790_v14  ;;  %v774_v1 = vsel %vm761_vm3, %v747_v9, %v748_v28  ;;  %v733_v0 = vsel %vm720_vm2, %v704_v50, %v705_v5 }
 0x103   : > { %v616_v3 = vpop.f32.mrf.mxu0  ;;  %v836_v12 = vpack.c.bf16 %v733_v0, %v733_v0  ;;  %v881_v58 = vpack.c.bf16 %v774_v1, %v774_v1 }
 0x104   : > { %v617_v25 = vadd.f32 %v2387_v34, %v616_v3 }
 0x105   : > { %v2519_v15 = vunpack.c.l.b16 %v836_v12 }
 0x106   : > { %v654_v48 = vmax.f32 %v617_v25, 0.0  ;;  %v2530_v25 = vunpack.c.l.b16 %v881_v58 }
 0x108   : > { %v706_v59 = vrot.slane %v654_v48, 7  ;;  %v749_v9 = vrot.slane %v654_v48, 1  ;;  %v791_v31 = vpack.c.bf16 %v654_v48, %v654_v48 }
 0x10a   : > { %v773_v50 = vsel %vm761_vm3, %v748_v28, %v749_v9  ;;  %v732_v0 = vsel %vm720_vm2, %v705_v5, %v706_v59 }
 0x10b   : > { %v618_v3 = vpop.f32.mrf.mxu0  ;;  %v862_v13 = vsel %vm850_vm4, %v773_v50, 0.0  ;;  %v817_v1 = vsel %vm803_vm5, %v732_v0, 0.0  ;;  %v959_v50 = vunpack.c.l.b16 %v791_v31 }
 0x10c   : > { %v619_v12 = vadd.f32 %v2387_v34, %v618_v3  ;;  %v882_v45 = vpack.c.bf16 %v862_v13, %v862_v13  ;;  %v837_v10 = vpack.c.bf16 %v817_v1, %v817_v1 }
 0x10e   : > { %v655_v44 = vmax.f32 %v619_v12, 0.0  ;;  %v2532_v30 = vunpack.c.l.b16 %v882_v45  ;;  %v2541_v12 = vunpack.c.l.b16 %v837_v10 }
 0x110   : > { %v707_v28 = vrot.slane %v655_v44, 7  ;;  %v792_v11 = vpack.c.bf16 %v655_v44, %v655_v44  ;;  %v750_v14 = vrot.slane %v655_v44, 1 }
 0x112   : > { %v960_v33 = vunpack.c.l.b16 %v792_v11  ;;  %v731_v58 = vsel %vm720_vm2, %v706_v59, %v707_v28  ;;  %v772_v31 = vsel %vm761_vm3, %v749_v9, %v750_v14 }
 0x113   : > { %v621_v3 = vpop.f32.mrf.mxu0  ;;  %v838_v13 = vpack.c.bf16 %v731_v58, %v731_v58  ;;  %v883_v1 = vpack.c.bf16 %v772_v31, %v772_v31 }
 0x114   : > { %v622_v45 = vadd.f32 %v2387_v34, %v621_v3  ;;  %v971_v48 = vpack.c.b16 %v960_v33, %v959_v50 }
 0x115   : > { %v2543_v0 = vunpack.c.l.b16 %v838_v13  ;;  %v1015_v9 = vunpack.c.l.b16 %v883_v1 }
 0x116   : > { %v656_v32 = vmax.f32 %v622_v45, 0.0  ;;  %983 = vrot.lane.b32.xlu0 %v971_v48, %s2074_s30 }
 0x118   : > { %v708_v44 = vrot.slane %v656_v32, 7  ;;  %v751_v59 = vrot.slane %v656_v32, 1  ;;  %v793_v11 = vpack.c.bf16 %v656_v32, %v656_v32 }
 0x11a   : > { %v771_v33 = vsel %vm761_vm3, %v750_v14, %v751_v59  ;;  %v730_v10 = vsel %vm720_vm2, %v707_v28, %v708_v44  ;;  %v961_v28 = vunpack.c.l.b16 %v793_v11 }
 0x11b   : > { %v623_v50 = vpop.f32.mrf.mxu0  ;;  %v864_v58 = vsel %vm850_vm4, %v771_v33, 0.0  ;;  %v819_v31 = vsel %vm803_vm5, %v730_v10, 0.0 }
 0x11c   : > { %v624_v3 = vadd.f32 %v2387_v34, %v623_v50  ;;  %v884_v13 = vpack.c.bf16 %v864_v58, %v864_v58  ;;  %v839_v40 = vpack.c.bf16 %v819_v31, %v819_v31 }
 0x11e   : > { %v657_v45 = vmax.f32 %v624_v3, 0.0  ;;  %v1016_v48 = vunpack.c.l.b16 %v884_v13  ;;  %v2563_v13 = vunpack.c.l.b16 %v839_v40 }
 0x120   : > { %v709_v51 = vrot.slane %v657_v45, 7  ;;  %v1027_v5 = vpack.c.b16 %v1016_v48, %v1015_v9  ;;  %v794_v14 = vpack.c.bf16 %v657_v45, %v657_v45  ;;  %v752_v18 = vrot.slane %v657_v45, 1 }
 0x122   : > { %1039 = vrot.lane.b32.xlu0 %v1027_v5, %s2075_s16  ;;  %v962_v33 = vunpack.c.l.b16 %v794_v14  ;;  %v729_v50 = vsel %vm720_vm2, %v708_v44, %v709_v51  ;;  %v770_v5 = vsel %vm761_vm3, %v751_v59, %v752_v18 }
 0x123   : > { %v626_v1 = vpop.f32.mrf.mxu0  ;;  %v840_v58 = vpack.c.bf16 %v729_v50, %v729_v50  ;;  %v885_v48 = vpack.c.bf16 %v770_v5, %v770_v5 }
 0x124   : > { %v627_v32 = vadd.f32 %v2387_v34, %v626_v1  ;;  %v972_v3 = vpack.c.b16 %v962_v33, %v961_v28 }
 0x125   : > { %v2565_v10 = vunpack.c.l.b16 %v840_v58  ;;  %v1017_v59 = vunpack.c.l.b16 %v885_v48 }
 0x126   : > { %v658_v9 = vmax.f32 %v627_v32, 0.0  ;;  %985 = vrot.lane.b32.xlu1 %v972_v3, %s2074_s30 }
 0x128   : > { %v710_v45 = vrot.slane %v658_v9, 7  ;;  %v753_v44 = vrot.slane %v658_v9, 1  ;;  %v795_v1 = vpack.c.bf16 %v658_v9, %v658_v9 }
 0x12a   : > { %v769_v31 = vsel %vm761_vm3, %v752_v18, %v753_v44  ;;  %v728_v40 = vsel %vm720_vm2, %v709_v51, %v710_v45  ;;  %v963_v51 = vunpack.c.l.b16 %v795_v1 }
 0x12b   : > { %v628_v14 = vpop.f32.mrf.mxu0  ;;  %v866_v28 = vsel %vm850_vm4, %v769_v31, 0.0  ;;  %v821_v3 = vsel %vm803_vm5, %v728_v40, 0.0 }
 0x12c   : > { %v629_v33 = vadd.f32 %v2387_v34, %v628_v14  ;;  %v886_v50 = vpack.c.bf16 %v866_v28, %v866_v28  ;;  %v841_v4 = vpack.c.bf16 %v821_v3, %v821_v3 }
 0x12e   : > { %v659_v58 = vmax.f32 %v629_v33, 0.0  ;;  %v1018_v32 = vunpack.c.l.b16 %v886_v50  ;;  %v2585_v33 = vunpack.c.l.b16 %v841_v4 }
 0x130   : > { %v711_v5 = vrot.slane %v659_v58, 7  ;;  %v796_v11 = vpack.c.bf16 %v659_v58, %v659_v58  ;;  %v1028_v18 = vpack.c.b16 %v1018_v32, %v1017_v59  ;;  %v754_v63 = vrot.slane %v659_v58, 1 }
 0x132   : > { %1041 = vrot.lane.b32.xlu1 %v1028_v18, %s2075_s16  ;;  %v964_v6 = vunpack.c.l.b16 %v796_v11  ;;  %v727_v31 = vsel %vm720_vm2, %v710_v45, %v711_v5  ;;  %v768_v59 = vsel %vm761_vm3, %v753_v44, %v754_v63 }
 0x133   : > { %v631_v14 = vpop.f32.mrf.mxu0  ;;  %v842_v48 = vpack.c.bf16 %v727_v31, %v727_v31  ;;  %v887_v58 = vpack.c.bf16 %v768_v59, %v768_v59 }
 0x134   : > { %v632_v9 = vadd.f32 %v2387_v34, %v631_v14  ;;  %v973_v28 = vpack.c.b16 %v964_v6, %v963_v51 }
 0x135   : > { %v2587_v40 = vunpack.c.l.b16 %v842_v48  ;;  %v1019_v44 = vunpack.c.l.b16 %v887_v58 }
 0x136   : > { %v660_v50 = vmax.f32 %v632_v9, 0.0  ;;  %987 = vrot.lane.b32.xlu0 %v973_v28, %s2074_s30 }
 0x138   : > { %v712_v1 = vrot.slane %v660_v50, 7  ;;  %v755_v45 = vrot.slane %v660_v50, 1  ;;  %v797_v48 = vpack.c.bf16 %v660_v50, %v660_v50 }
 0x13a   : > { %v767_v32 = vsel %vm761_vm3, %v754_v63, %v755_v45  ;;  %v726_v4 = vsel %vm720_vm2, %v711_v5, %v712_v1  ;;  %v965_v5 = vunpack.c.l.b16 %v797_v48 }
 0x13b   : > { %v633_v6 = vpop.f32.mrf.mxu0  ;;  %v868_v3 = vsel %vm850_vm4, %v767_v32, 0.0  ;;  %v823_v9 = vsel %vm803_vm5, %v726_v4, 0.0 }
 0x13c   : > { %v634_v18 = vadd.f32 %v2387_v34, %v633_v6  ;;  %v888_v51 = vpack.c.bf16 %v868_v3, %v868_v3  ;;  %v843_v11 = vpack.c.bf16 %v823_v9, %v823_v9 }
 0x13e   : > { %v661_v31 = vmax.f32 %v634_v18, 0.0  ;;  %v1020_v14 = vunpack.c.l.b16 %v888_v51  ;;  %v2607_v51 = vunpack.c.l.b16 %v843_v11 }
 0x140   : > { %v713_v28 = vrot.slane %v661_v31, 7  ;;  %v1029_v59 = vpack.c.b16 %v1020_v14, %v1019_v44  ;;  %v798_v63 = vpack.c.bf16 %v661_v31, %v661_v31  ;;  %v756_v6 = vrot.slane %v661_v31, 1 }
 0x142   : > { %1043 = vrot.lane.b32.xlu1 %v1029_v59, %s2075_s16  ;;  %v966_v47 = vunpack.c.l.b16 %v798_v63  ;;  %v725_v32 = vsel %vm720_vm2, %v712_v1, %v713_v28  ;;  %v766_v14 = vsel %vm761_vm3, %v755_v45, %v756_v6 }
 0x143   : > { %v636_v58 = vpop.f32.mrf.mxu0  ;;  %v844_v3 = vpack.c.bf16 %v725_v32, %v725_v32  ;;  %v889_v11 = vpack.c.bf16 %v766_v14, %v766_v14 }
 0x144   : > { %v637_v50 = vadd.f32 %v2387_v34, %v636_v58  ;;  %v974_v18 = vpack.c.b16 %v966_v47, %v965_v5 }
 0x145   : > { %v2609_v4 = vunpack.c.l.b16 %v844_v3  ;;  %v1021_v58 = vunpack.c.l.b16 %v889_v11 }
 0x146   : > { %v662_v44 = vmax.f32 %v637_v50, 0.0  ;;  %989 = vrot.lane.b32.xlu2 %v974_v18, %s2074_s30 }
 0x147   : > { %v934_v1 = vpack.c.b16 %v2609_v4, %v2607_v51  ;;  %v1753_v51 = vld [vmem:[%s3014_s5 + $0x18] sm:$0xff] }
 0x148   : > { %v714_v31 = vrot.slane %v662_v44, 7  ;;  %v757_v48 = vrot.slane %v662_v44, 1  ;;  %v799_v18 = vpack.c.bf16 %v662_v44, %v662_v44 }
 0x14a   : > { %975 = vrot.lane.b32.xlu1 %v967_v23, %s2074_s30  ;;  %v765_v47 = vsel %vm761_vm3, %v756_v6, %v757_v48  ;;  %v724_v9 = vsel %vm720_vm2, %v713_v28, %v714_v31  ;;  %v672_v28 = vstv %s671_s24  ;;  %v1099_v37 = vunpack.c.l.b16 %v799_v18 }
 0x14b   : > { %v638_v59 = vpop.f32.mrf.mxu0  ;;  %v870_v45 = vsel %vm850_vm4, %v765_v47, 0.0  ;;  %v825_v16 = vsel %vm803_vm5, %v724_v9, 0.0  ;;  %vm2638_vm6 = vcmp.eq.s32.totalorder %v672_v28, 1 }
 0x14c   : > { %v639_v63 = vadd.f32 %v2387_v34, %v638_v59  ;;  %v890_v5 = vpack.c.bf16 %v870_v45, %v870_v45  ;;  %v845_v50 = vpack.c.bf16 %v825_v16, %v825_v16 }
 0x14e   : > { %v663_v32 = vmax.f32 %v639_v63, 0.0  ;;  %v1022_v3 = vunpack.c.l.b16 %v890_v5  ;;  %v2642_v44 = vunpack.c.l.b16 %v845_v50 }
 0x150   : > { %v715_v17 = vrot.slane %v663_v32, 7  ;;  %v800_v23 = vpack.c.bf16 %v663_v32, %v663_v32  ;;  %v1030_v6 = vpack.c.b16 %v1022_v3, %v1021_v58  ;;  %v758_v59 = vrot.slane %v663_v32, 1 }
 0x152   : > { %1045 = vrot.lane.b32.xlu2 %v1030_v6, %s2075_s16  ;;  %1035 = vrot.lane.b32.xlu1 %v1025_v52, %s2075_s16  ;;  %v723_v14 = vsel %vm720_vm2, %v714_v31, %v715_v17  ;;  %v1100_v45 = vunpack.c.l.b16 %v800_v23  ;;  %v764_v58 = vsel %vm761_vm3, %v757_v48, %v758_v59  ;;  %v3058_v23 = vpack.c.b16 %v2508_v38, %v2506_v35 }
 0x153   : > { %v641_v47 = vpop.f32.mrf.mxu0  ;;  %v846_v11 = vpack.c.bf16 %v723_v14, %v723_v14  ;;  %v891_v28 = vpack.c.bf16 %v764_v58, %v764_v58 }
 0x154   : > { %v642_v9 = vadd.f32 %v2387_v34, %v641_v47  ;;  %v1101_v32 = vpack.c.b16 %v1100_v45, %v1099_v37 }
 0x155   : > { %v2644_v5 = vunpack.c.l.b16 %v846_v11 }
 0x156   : > { %v664_v29 = vmax.f32 %v642_v9, 0.0  ;;  %v1106_v9 = vunpack.c.l.b16 %v891_v28 }
 0x157   : > { %v1096_v52 = vpack.c.b16 %v2644_v5, %v2642_v44 }
 0x158   : > { %v2650_v31 = vsel %vm2638_vm6, %v664_v29, 0.0 }
 0x159   : > { %v716_v3 = vrot.slane %v2650_v31, 7  ;;  %v759_v16 = vrot.slane %v2650_v31, 1 }
 0x15a   : > { %1102 = vrot.lane.b32.xlu2 %v1101_v32, %s2074_s30  ;;  %981 = vrot.lane.b32.xlu1 %v3058_v23, %s2074_s30  ;;  %v3060_v32 = vrot.slane %v2393_v53, 7  ;;  %v3061_v23 = vrot.slane %v2393_v53, 1 }
 0x15b   : > { %v722_v6 = vsel %vm720_vm2, %v715_v17, %v716_v3  ;;  %v643_v50 = vpop.f32.mrf.mxu0  ;;  %v763_v18 = vsel %vm761_vm3, %v758_v59, %v759_v16  ;;  %v830_v59 = vpack.c.bf16 %v2416_v20, %v2416_v20 }
 0x15c   : > { %v644_v48 = vadd.f32 %v2387_v34, %v643_v50  ;;  %v872_v14 = vsel %vm850_vm4, %v763_v18, 0.0  ;;  %v827_v38 = vsel %vm803_vm5, %v722_v6, 0.0  ;;  %v3059_v34 = vpack.c.b16 %v2436_v49, %v2434_v43 }
 0x15d   : > { %v892_v47 = vpack.c.bf16 %v872_v14, %v872_v14  ;;  %v847_v43 = vpack.c.bf16 %v827_v38, %v827_v38  ;;  %v1689_v38 = vld [vmem:[%s3014_s5 + $0x14] sm:$0xf] }
 0x15e   : > { %v665_v11 = vmax.f32 %v644_v48, 0.0 }
 0x15f   : > { %v1107_v45 = vunpack.c.l.b16 %v892_v47  ;;  %v2695_v47 = vunpack.c.l.b16 %v830_v59 }
 0x160   : > { %v697_v35 = vsel %vm2638_vm6, %v665_v11, 0.0 }
 0x161   : > { %v717_v17 = vrot.slane %v697_v35, 7  ;;  %v760_v29 = vrot.slane %v697_v35, 1  ;;  %v1108_v37 = vpack.c.b16 %v1107_v45, %v1106_v9  ;;  %v2699_v9 = vunpack.c.l.b16 %v847_v43 }
 0x162   : > { %1031 = vrot.lane.b32.xlu2 %v3059_v34, %s2075_s16 }
 0x163   : > { %v740_v63 = vsel %vm720_vm2, %v717_v17, %v3060_v32  ;;  %1109 = vrot.lane.b32.xlu0 %v1108_v37, %s2075_s16  ;;  %v762_v58 = vsel %vm761_vm3, %v759_v16, %v760_v29  ;;  %v781_v6 = vsel %vm761_vm3, %v760_v29, %v3061_v23  ;;  %v721_v18 = vsel %vm720_vm2, %v716_v3, %v717_v17  ;;  %v1752_v32 = vld [vmem:[%s3014_s5 + $0xc] sm:$0xff] }
 0x164   : > { %v874_v49 = vsel %vm850_vm4, %v781_v6, 0.0  ;;  %v893_v20 = vpack.c.bf16 %v762_v58, %v762_v58  ;;  %v809_v50 = vsel %vm803_vm5, %v740_v63, 0.0  ;;  %v848_v14 = vpack.c.bf16 %v721_v18, %v721_v18 }
 0x165   : > { %v894_v28 = vpack.c.bf16 %v874_v49, %v874_v49  ;;  %v829_v48 = vpack.c.bf16 %v809_v50, %v809_v50  ;;  %v3062_v17 = vpack.c.b16 %v2444_v62, %v2442_v60  ;;  %v1125_v29 = vunpack.c.l.b16 %v1689_v38 }
 0x166   : > { %v1276_v16 = vunpack.c.l.b16 %v893_v20  ;;  %v2701_v22 = vunpack.c.l.b16 %v848_v14  ;;  %v3063_v37 = vpack.c.b16 %v2478_v36, %v2476_v26  ;;  %v802_v60 = vpack.c.bf16 %v697_v35, %v697_v35  ;;  %v1716_v14 = vld [vmem:[%s3014_s5 + $0x20] sm:$0xf] }
 0x167   : > { %v1277_v53 = vunpack.c.l.b16 %v894_v28  ;;  %v2697_v11 = vunpack.c.l.b16 %v829_v48  ;;  %v1127_v34 = vpack.c.b16 %v1125_v29, %v1125_v29  ;;  %v3064_v62 = vpack.c.b16 %v2532_v30, %v2530_v25 }
 0x168   : > { %v1266_v3 = vpack.c.b16 %v2701_v22, %v2699_v9  ;;  %v801_v26 = vpack.c.bf16 %v2650_v31, %v2650_v31  ;;  %v3065_v36 = vpack.c.b16 %v2468_v57, %v2466_v2  ;;  %v1270_v63 = vunpack.c.l.b16 %v802_v60  ;;  %v1091_v57 = vld [vmem:[%s3014_s5 + $0x8] sm:$0xf]  ;;  %v2849_v9 = vld [vmem:[%s3015_s6] ss:$0 sm:$0xff] }
 0x169   : > { %v1278_v45 = vpack.c.b16 %v1277_v53, %v1276_v16  ;;  %v927_v56 = vpack.c.b16 %v2695_v47, %v2697_v11  ;;  %v1148_v59 = vsel %vm1146_vm7, %v1127_v34, 0  ;;  %v3066_v30 = vpack.c.b16 %v2543_v0, %v2541_v12  ;;  %v1751_v12 = vld [vmem:[%s3014_s5] sm:$0xff] }
 0x16a   : > { %977 = vrot.lane.b32.xlu2 %v3062_v17, %s2074_s30  ;;  %1802 = vmatpush.bf16.msra.mxu2 %v1148_v59  ;;  %v1269_v58 = vunpack.c.l.b16 %v801_v26  ;;  %v1204_v6 = vunpack.c.l.b16 %v1091_v57  ;;  %v3067_v0 = vpack.c.b16 %v2565_v10, %v2563_v13  ;;  %v1295_v16 = vunpack.c.l.b16 %v1716_v14 }
 0x16b   : > { %979 = vrot.lane.b32.xlu0 %v3063_v37, %s2074_s30  ;;  %1279 = vrot.lane.b32.xlu1 %v1278_v45, %s2075_s16  ;;  %v3068_v29 = vpack.c.b16 %v2587_v40, %v2585_v33  ;;  %v3069_v47 = vpack.c.b16 %v2487_v54, %v2485_v46  ;;  %v3071_v54 = vpack.c.b16 %v2519_v15, %v2517_v39 }
 0x16c   : > { %1803 = vmatpush.bf16.msra.mxu3 %v1148_v59  ;;  %1156 = vmatpush.bf16.msra.mxu1 %v1148_v59  ;;  %v1271_v23 = vpack.c.b16 %v1270_v63, %v1269_v58  ;;  %v1206_v43 = vpack.c.b16 %v1204_v6, %v1204_v6  ;;  %v1297_v53 = vpack.c.b16 %v1295_v16, %v1295_v16 }
 0x16e   : > { %1804 = vmatpush.bf16.msra.mxu2 %v1752_v32  ;;  %v1211_v49 = vsel %vm1146_vm7, %v1206_v43, 0  ;;  %v1302_v45 = vsel %vm1146_vm7, %v1297_v53, 0 }
 0x170   : > { %1805 = vmatpush.bf16.msra.mxu3 %v1752_v32  ;;  %1157 = vmatpush.bf16.msra.mxu1 %v1752_v32 }
 0x172   : > { %1037 = vrot.lane.b32.xlu2 %v3064_v62, %s2075_s16  ;;  %1219 = vmatpush.bf16.msrb.mxu2 %v1211_v49 }
 0x173   : > { %1033 = vrot.lane.b32.xlu0 %v3065_v36, %s2075_s16  ;;  %s1554_s16 = scalar_lea.hbm %s3088_s22, %s1741_s18 }
 0x174   : > { %1310 = vmatpush.bf16.msrb.mxu3 %v1302_v45  ;;  %s1557_s24 = sshll.u32 %s1554_s16, 4  ;;  %s1558_s24 = int_to_ptr.hbm [resolvable:$true] %s1557_s24 }
 0x175   : > { %s1962_s17 = sshra.s32 %s1558_s24, 4  ;;  %s1963_s17 = int_to_ptr.hbm [resolvable:$true] %s1962_s17 }
 0x176   : > { %1220 = vmatpush.bf16.msrb.mxu2 %v1751_v12  ;;  %s1964_s19 = scalar_lea.hbm %s1963_s17, 64  ;;  %p1969_p1 = scmp.lt.s32.totalorder %s1963_s17, %s3088_s22 }
 0x177   : > { %p1965_p11 = scmp.ne.s32.totalorder %s1963_s17, %s1964_s19  ;;  %p1970_p4 = scmp.lt.s32.totalorder %s1968_s12, %s1964_s19 }
 0x178   : > { %1311 = vmatpush.bf16.msrb.mxu3 %v1753_v51 }
 0x179   : > { %p1966_p13 = pnand %p1965_p11, %p2205_p12  ;;  %p1971_p5 = por %p1970_p4, %p1969_p1 }
 0x17b   : > { %1272 = vrot.lane.b32.xlu0 %v1271_v23, %s2074_s30  ;;  %p1967_p0 = pneg %p1966_p13 }
 0x17d   : > { %p1972_p6 = pnand %p1971_p5, %p1967_p0 }
 0x188   : > { %v984_v35 = vpop.permute.xlu0 %983 }
 0x189   : > { %v1062_v25 = vsel %vm1047_vm8, %v3066_v30, %v984_v35  ;;  %v1413_v30 = vld [vmem:[%s3016_s7] sm:$0xf] }
 0x194   : > { %v1040_v31 = vpop.permute.xlu0 %1039 }
 0x195   : > { %v1082_v2 = vsel %vm1072_vm9, %v1062_v25, %v1040_v31  ;;  %v1439_v25 = vsel %vm1146_vm7, %v1413_v30, 0 }
 0x196   : > { %1697 = vmatmul.msk.bf16.vlgmr.msra.gmra.mxu2 %vm1129_vm10, %v1082_v2  ;;  %1448 = vmatpush.bf16.msrb.mxu1 %v1439_v25 }
 0x198   : > { %v986_v20 = vpop.permute.xlu1 %985 }
 0x199   : > { %v1065_v50 = vsel %vm1047_vm8, %v3067_v0, %v986_v20 }
 0x1a0   : > { %v990_v18 = vpop.permute.xlu2 %989 }
 0x1a1   : > { %v1071_v13 = vsel %vm1047_vm8, %v934_v1, %v990_v18 }
 0x1a4   : > { %v1042_v28 = vpop.permute.xlu1 %1041 }
 0x1a5   : > { %v1084_v48 = vsel %vm1072_vm9, %v1065_v50, %v1042_v28 }
 0x1a6   : > { %1698 = vmatmul.msk.bf16.gmra.mxu2 %vm1129_vm10, %v1084_v48 }
 0x1a8   : > { %v988_v17 = vpop.permute.xlu0 %987 }
 0x1a9   : > { %v1068_v37 = vsel %vm1047_vm8, %v3068_v29, %v988_v17 }
 0x1ac   : > { %v1046_v10 = vpop.permute.xlu2 %1045 }
 0x1ad   : > { %v1088_v38 = vsel %vm1072_vm9, %v1071_v13, %v1046_v10 }
 0x1ae   : > { %1700 = vmatmul.msk.bf16.vlgmr.msra.gmra.mxu3 %vm1129_vm10, %v1088_v38 }
 0x1b4   : > { %v1044_v34 = vpop.permute.xlu1 %1043  ;;  %v1103_v4 = vpop.permute.xlu2 %1102 }
 0x1b5   : > { %v1086_v59 = vsel %vm1072_vm9, %v1068_v37, %v1044_v34  ;;  %v1113_v60 = vsel %vm1047_vm8, %v1096_v52, %v1103_v4 }
 0x1b6   : > { %1699 = vmatmul.msk.bf16.gmra.mxu2 %vm1129_vm10, %v1086_v59 }
 0x1bc   : > { %v976_v1 = vpop.permute.xlu1 %975  ;;  %v1032_v33 = vpop.permute.xlu2 %1031 }
 0x1bd   : > { %v1050_v32 = vsel %vm1047_vm8, %v927_v56, %v976_v1  ;;  %v3070_v56 = vpack.c.b16 %v2455_v21, %v2453_v19 }
 0x1be   : > { %v1074_v40 = vsel %vm1072_vm9, %v1050_v32, %v1032_v33 }
 0x1c4   : > { %v978_v63 = vpop.permute.xlu2 %977  ;;  %v1036_v5 = vpop.permute.xlu1 %1035 }
 0x1c5   : > { %v1053_v58 = vsel %vm1047_vm8, %v3070_v56, %v978_v63 }
 0x1c6   : > { %1706 = vmatmul.msk.bf16.vlgmr.msrb.gmra.mxu2 %vm1129_vm10, %v1074_v40 }
 0x1cc   : > { %v982_v46 = vpop.permute.xlu1 %981  ;;  %v1038_v21 = vpop.permute.xlu2 %1037 }
 0x1cd   : > { %v1059_v19 = vsel %vm1047_vm8, %v3071_v54, %v982_v46 }
 0x1ce   : > { %v1080_v35 = vsel %vm1072_vm9, %v1059_v19, %v1038_v21 }
 0x1d5   : > { %v1110_v62 = vpop.permute.xlu0 %1109 }
 0x1d6   : > { %v1115_v26 = vsel %vm1072_vm9, %v1113_v60, %v1110_v62 }
 0x1d7   : > { %1701 = vmatmul.msk.bf16.gmra.mxu3 %vm1129_vm10, %v1115_v26 }
 0x1dd   : > { %v980_v36 = vpop.permute.xlu0 %979  ;;  %v1280_v0 = vpop.permute.xlu1 %1279 }
 0x1de   : > { %v1056_v11 = vsel %vm1047_vm8, %v3069_v47, %v980_v36 }
 0x1df   : > { %v1078_v23 = vsel %vm1072_vm9, %v1056_v11, %v1036_v5 }
 0x1e5   : > { %v1034_v44 = vpop.permute.xlu0 %1033 }
 0x1e6   : > { %v1076_v52 = vsel %vm1072_vm9, %v1053_v58, %v1034_v44 }
 0x1e7   : > { %1694 = vmatmul.msk.bf16.vlgmr.msra.gmra.mxu1 %vm1129_vm10, %v1076_v52  ;;  %1707 = vmatmul.msk.bf16.gmra.mxu2 %vm1129_vm10, %v1076_v52 }
 0x1e8   : > { %1721 = vmatmul.msk.bf16.vlgmr.msrb.gmra.mxu3 %vm1129_vm10, %v1078_v23 }
 0x1ed   : > { %v1273_v49 = vpop.permute.xlu0 %1272 }
 0x1ee   : > { %v1283_v12 = vsel %vm1047_vm8, %v1266_v3, %v1273_v49 }
 0x1ef   : > { %v1285_v50 = vsel %vm1072_vm9, %v1283_v12, %v1280_v0 }
 0x1f7   : > { %1695 = vmatmul.msk.bf16.gmra.mxu1 %vm1129_vm10, %v1078_v23  ;;  %1708 = vmatmul.msk.bf16.gmra.mxu2 %vm1129_vm10, %v1078_v23 }
 0x1f8   : > { %1722 = vmatmul.msk.bf16.gmra.mxu3 %vm1129_vm10, %v1080_v35 }
 0x207   : > { %1696 = vmatmul.msk.bf16.gmra.mxu1 %vm1129_vm10, %v1080_v35  ;;  %1709 = vmatmul.msk.bf16.gmra.mxu2 %vm1129_vm10, %v1080_v35 }
 0x208   : > { %1723 = vmatmul.msk.bf16.gmra.mxu3 %vm1129_vm10, %v1082_v2 }
 0x217   : > { %1710 = vmatmul.msk.bf16.gmra.mxu2 %vm1129_vm10, %v1082_v2 }
 0x218   : > { %1724 = vmatmul.msk.bf16.gmra.mxu3 %vm1129_vm10, %v1084_v48 }
 0x219   : > { %v2810_v39 = vpop.f32.mrf.mxu2 }
 0x221   : > { %v2812_v15 = vpop.f32.mrf.mxu2 }
 0x227   : > { %1711 = vmatmul.msk.bf16.gmra.mxu2 %vm1129_vm10, %v1084_v48 }
 0x228   : > { %1725 = vmatmul.msk.bf16.gmra.mxu3 %vm1129_vm10, %v1086_v59 }
 0x229   : > { %v2820_v31 = vpop.f32.mrf.mxu2 }
 0x231   : > { %v2824_v2 = vpop.f32.mrf.mxu2  ;;  %v2829_v6 = vpop.f32.mrf.mxu3 }
 0x237   : > { %1712 = vmatmul.msk.bf16.gmra.mxu2 %vm1129_vm10, %v1086_v59 }
 0x238   : > { %1726 = vmatmul.msk.bf16.gmra.mxu3 %vm1129_vm10, %v1088_v38 }
 0x239   : > { %v2826_v57 = vpop.f32.mrf.mxu2  ;;  %v2834_v20 = vpop.f32.mrf.mxu3 }
 0x241   : > { %v2832_v43 = vpop.f32.mrf.mxu2 }
 0x247   : > { %1713 = vmatmul.msk.bf16.gmra.mxu2 %vm1129_vm10, %v1088_v38 }
 0x248   : > { %1727 = vmatmul.msk.bf16.gmra.mxu3 %vm1129_vm10, %v1115_v26 }
 0x249   : > { %v1222_v18 = vpop.f32.mrf.mxu2 }
 0x251   : > { %v1224_v48 = vpop.f32.mrf.mxu2 }
 0x258   : > { %1728 = vmatmul.msk.bf16.gmra.mxu3 %vm1129_vm10, %v1285_v50 }
 0x25a   : > { %v2842_v28 = vpop.f32.mrf.mxu3 }
 0x262   : > { %v2844_v14 = vpop.f32.mrf.mxu3 }
 0x264   : > { %v1159_v16 = vpop.f32.mrf.mxu1 }
 0x265   : > { %v1223_v10 = vadd.f32 %v1222_v18, %v1159_v16 }
 0x26a   : > { %v1227_v53 = vpop.f32.mrf.mxu2 }
 0x26b   : > { %v1313_v45 = vpop.f32.mrf.mxu3 }
 0x26c   : > { %v1161_v13 = vpop.f32.mrf.mxu1  ;;  %v1353_v38 = vadd.f32 %v1313_v45, %v1223_v10 }
 0x26d   : > { %v1225_v22 = vadd.f32 %v1224_v48, %v1161_v13 }
 0x26e   : > { %v1373_v29 = vadd.f32 %v2849_v9, %v1353_v38 }
 0x270   : > { %v1389_v51 = vmax.f32 %v1373_v29, 0.0 }
 0x272   : > { %v1229_v3 = vpop.f32.mrf.mxu2 }
 0x273   : > { %v1315_v17 = vpop.f32.mrf.mxu3 }
 0x274   : > { %v1354_v37 = vadd.f32 %v1315_v17, %v1225_v22  ;;  %v1164_v34 = vpop.f32.mrf.mxu1 }
 0x275   : > { %v1228_v60 = vadd.f32 %v1227_v53, %v1164_v34 }
 0x276   : > { %v1374_v59 = vadd.f32 %v2849_v9, %v1354_v37 }
 0x278   : > { %v1390_v4 = vmax.f32 %v1374_v59, 0.0 }
 0x27a   : > { %v1405_v1 = vpack.c.bf16 %v1390_v4, %v1389_v51  ;;  %v1232_v32 = vpop.f32.mrf.mxu2 }
 0x27b   : > { %v1318_v33 = vpop.f32.mrf.mxu3 }
 0x27c   : > { %1729 = vmatmul.msk.bf16.vlgmr.msrb.gmra.mxu1 %vm1047_vm8, %v1405_v1  ;;  %v1166_v40 = vpop.f32.mrf.mxu1  ;;  %v1355_v62 = vadd.f32 %v1318_v33, %v1228_v60 }
 0x27d   : > { %v1230_v26 = vadd.f32 %v1229_v3, %v1166_v40 }
 0x27e   : > { %v1375_v47 = vadd.f32 %v2849_v9, %v1355_v62 }
 0x280   : > { %v1391_v44 = vmax.f32 %v1375_v47, 0.0 }
 0x282   : > { %v1234_v36 = vpop.f32.mrf.mxu2 }
 0x283   : > { %v1320_v63 = vpop.f32.mrf.mxu3 }
 0x284   : > { %v1356_v11 = vadd.f32 %v1320_v63, %v1230_v26  ;;  %v1169_v56 = vpop.f32.mrf.mxu1 }
 0x285   : > { %v1233_v54 = vadd.f32 %v1232_v32, %v1169_v56 }
 0x286   : > { %v1376_v58 = vadd.f32 %v2849_v9, %v1356_v11 }
 0x288   : > { %v1392_v5 = vmax.f32 %v1376_v58, 0.0 }
 0x28a   : > { %v1237_v52 = vpop.f32.mrf.mxu2  ;;  %v1406_v23 = vpack.c.bf16 %v1392_v5, %v1391_v44 }
 0x28b   : > { %v1323_v46 = vpop.f32.mrf.mxu3  ;;  %v1238_v45 = vadd.f32 %v1237_v52, %v2810_v39 }
 0x28c   : > { %1730 = vmatmul.msk.bf16.gmra.mxu1 %vm1047_vm8, %v1406_v23  ;;  %v1171_v19 = vpop.f32.mrf.mxu1  ;;  %v1357_v21 = vadd.f32 %v1323_v46, %v1233_v54 }
 0x28d   : > { %v1235_v35 = vadd.f32 %v1234_v36, %v1171_v19 }
 0x28e   : > { %v1377_v49 = vadd.f32 %v2849_v9, %v1357_v21 }
 0x290   : > { %v1393_v50 = vmax.f32 %v1377_v49, 0.0 }
 0x292   : > { %v1239_v30 = vpop.f32.mrf.mxu2 }
 0x293   : > { %v1325_v25 = vpop.f32.mrf.mxu3  ;;  %v1240_v10 = vadd.f32 %v1239_v30, %v2812_v15 }
 0x294   : > { %v1358_v12 = vadd.f32 %v1325_v25, %v1235_v35 }
 0x296   : > { %v1378_v0 = vadd.f32 %v2849_v9, %v1358_v12 }
 0x298   : > { %v1394_v18 = vmax.f32 %v1378_v0, 0.0 }
 0x29a   : > { %v1242_v48 = vpop.f32.mrf.mxu2  ;;  %v1407_v16 = vpack.c.bf16 %v1394_v18, %v1393_v50 }
 0x29b   : > { %v1328_v53 = vpop.f32.mrf.mxu3  ;;  %v1243_v1 = vadd.f32 %v1242_v48, %v2820_v31 }
 0x29c   : > { %1731 = vmatmul.msk.bf16.gmra.mxu1 %vm1047_vm8, %v1407_v16  ;;  %v1359_v13 = vadd.f32 %v1328_v53, %v1238_v45 }
 0x29e   : > { %v1379_v3 = vadd.f32 %v2849_v9, %v1359_v13 }
 0x2a0   : > { %v1395_v37 = vmax.f32 %v1379_v3, 0.0 }
 0x2a2   : > { %v1244_v38 = vpop.f32.mrf.mxu2 }
 0x2a3   : > { %v1330_v22 = vpop.f32.mrf.mxu3  ;;  %v1245_v32 = vadd.f32 %v1244_v38, %v2824_v2 }
 0x2a4   : > { %v1360_v17 = vadd.f32 %v1330_v22, %v1240_v10 }
 0x2a6   : > { %v1380_v29 = vadd.f32 %v2849_v9, %v1360_v17 }
 0x2a8   : > { %v1396_v34 = vmax.f32 %v1380_v29, 0.0 }
 0x2aa   : > { %v1408_v59 = vpack.c.bf16 %v1396_v34, %v1395_v37  ;;  %v1247_v4 = vpop.f32.mrf.mxu2 }
 0x2ab   : > { %v1333_v51 = vpop.f32.mrf.mxu3  ;;  %v1248_v11 = vadd.f32 %v1247_v4, %v2826_v57 }
 0x2ac   : > { %1732 = vmatmul.msk.bf16.gmra.mxu1 %vm1047_vm8, %v1408_v59  ;;  %v1361_v39 = vadd.f32 %v1333_v51, %v1243_v1  ;;  %v3073_v59 = vunpack.c.h.bf16 %v2263_v7 }
 0x2ae   : > { %v1381_v33 = vadd.f32 %v2849_v9, %v1361_v39  ;;  %v3074_v39 = vunpack.c.l.bf16 %v2281_v27 }
 0x2b0   : > { %v1397_v26 = vmax.f32 %v1381_v33, 0.0 }
 0x2b2   : > { %v1249_v62 = vpop.f32.mrf.mxu2 }
 0x2b3   : > { %v1335_v15 = vpop.f32.mrf.mxu3  ;;  %v1250_v58 = vadd.f32 %v1249_v62, %v2832_v43 }
 0x2b4   : > { %v1362_v40 = vadd.f32 %v1335_v15, %v1245_v32 }
 0x2b6   : > { %v1382_v60 = vadd.f32 %v2849_v9, %v1362_v40  ;;  %v3075_v40 = vunpack.c.h.bf16 %v2281_v27 }
 0x2b8   : > { %v1398_v36 = vmax.f32 %v1382_v60, 0.0 }
 0x2ba   : > { %v1409_v63 = vpack.c.bf16 %v1398_v36, %v1397_v26  ;;  %v1252_v31 = vpop.f32.mrf.mxu2  ;;  %v3076_v26 = vunpack.c.l.bf16 %v2295_v41 }
 0x2bb   : > { %v1338_v47 = vpop.f32.mrf.mxu3  ;;  %v1253_v35 = vadd.f32 %v1252_v31, %v2829_v6 }
 0x2bc   : > { %1733 = vmatmul.msk.bf16.gmra.mxu1 %vm1047_vm8, %v1409_v63  ;;  %v1363_v56 = vadd.f32 %v1338_v47, %v1248_v11  ;;  %v3077_v11 = vunpack.c.h.bf16 %v2295_v41 }
 0x2be   : > { %v1383_v44 = vadd.f32 %v2849_v9, %v1363_v56 }
 0x2c0   : > { %v1399_v23 = vmax.f32 %v1383_v44, 0.0 }
 0x2c2   : > { %v1254_v19 = vpop.f32.mrf.mxu2 }
 0x2c3   : > { %v1340_v2 = vpop.f32.mrf.mxu3  ;;  %v1255_v30 = vadd.f32 %v1254_v19, %v2834_v20 }
 0x2c4   : > { %v1364_v5 = vadd.f32 %v1340_v2, %v1250_v58  ;;  %v3078_v58 = vunpack.c.l.bf16 %v2309_v55 }
 0x2c6   : > { %v1384_v52 = vadd.f32 %v2849_v9, %v1364_v5 }
 0x2c8   : > { %v1400_v46 = vmax.f32 %v1384_v52, 0.0  ;;  %v3079_v52 = vunpack.c.h.bf16 %v2309_v55 }
 0x2ca   : > { %v1410_v54 = vpack.c.bf16 %v1400_v46, %v1399_v23  ;;  %v1257_v12 = vpop.f32.mrf.mxu2 }
 0x2cb   : > { %v1343_v21 = vpop.f32.mrf.mxu3  ;;  %v1258_v6 = vadd.f32 %v1257_v12, %v2842_v28  ;;  %v3072_v28 = vunpack.c.l.bf16 %v2263_v7 }
 0x2cc   : > { %1734 = vmatmul.msk.bf16.gmra.mxu1 %vm1047_vm8, %v1410_v54  ;;  %v1365_v57 = vadd.f32 %v1343_v21, %v1253_v35  ;;  %v3080_v54 = vunpack.c.l.bf16 %v2323_v8 }
 0x2ce   : > { %v1385_v43 = vadd.f32 %v2849_v9, %v1365_v57  ;;  %v3081_v57 = vunpack.c.h.bf16 %v2323_v8 }
 0x2d0   : > { %v1401_v50 = vmax.f32 %v1385_v43, 0.0  ;;  %v3082_v43 = vunpack.c.l.bf16 %v2337_v24 }
 0x2d2   : > { %v1259_v53 = vpop.f32.mrf.mxu2 }
 0x2d3   : > { %v1345_v25 = vpop.f32.mrf.mxu3  ;;  %v1260_v20 = vadd.f32 %v1259_v53, %v2844_v14 }
 0x2d4   : > { %v1366_v49 = vadd.f32 %v1345_v25, %v1255_v30 }
 0x2d6   : > { %v1386_v0 = vadd.f32 %v2849_v9, %v1366_v49 }
 0x2d8   : > { %v1402_v18 = vmax.f32 %v1386_v0, 0.0 }
 0x2da   : > { %v1411_v48 = vpack.c.bf16 %v1402_v18, %v1401_v50  ;;  %v3084_v50 = vunpack.c.h.bf16 %v2337_v24 }
 0x2db   : > { %v1348_v16 = vpop.f32.mrf.mxu3 }
 0x2dc   : > { %1735 = vmatmul.msk.bf16.gmra.mxu1 %vm1047_vm8, %v1411_v48  ;;  %v1367_v45 = vadd.f32 %v1348_v16, %v1258_v6  ;;  %v3085_v16 = vunpack.c.l.bf16 %v2351_v42 }
 0x2de   : > { %v1387_v10 = vadd.f32 %v2849_v9, %v1367_v45 }
 0x2e0   : > { %v1403_v3 = vmax.f32 %v1387_v10, 0.0 }
 0x2e3   : > { %v1350_v13 = vpop.f32.mrf.mxu3 }
 0x2e4   : > { %v1368_v38 = vadd.f32 %v1350_v13, %v1260_v20  ;;  %v3086_v20 = vunpack.c.h.bf16 %v2351_v42 }
 0x2e6   : > { %v1388_v22 = vadd.f32 %v2849_v9, %v1368_v38  ;;  %v3087_v38 = vunpack.c.l.bf16 %v2367_v61 }
 0x2e8   : > { %v1404_v17 = vmax.f32 %v1388_v22, 0.0 }
 0x2ea   : > { %v1412_v29 = vpack.c.bf16 %v1404_v17, %v1403_v3  ;;  %v3090_v17 = vunpack.c.h.bf16 %v2367_v61 }
 0x2ec   : > { %1736 = vmatmul.msk.bf16.gmra.mxu1 %vm1047_vm8, %v1412_v29 }
 0x2f9   : > { %v1450_v37 = vpop.f32.mrf.mxu1 }
 0x2fa   : > { %v1490_v34 = vadd.f32 %v3072_v28, %v1450_v37 }
 0x2fc   : > { %v1506_v14 = vpack.c.bf16 %v1490_v34, %v1490_v34 }
 0x2fe   : > { %1523 = vst.msk [vmem:[%s2890_s23] sm:$0xf] %vm1522_vm11, %v1506_v14 }
 0x301   : > { %v1452_v9 = vpop.f32.mrf.mxu1 }
 0x302   : > { %v1491_v51 = vadd.f32 %v3073_v59, %v1452_v9 }
 0x304   : > { %v1507_v4 = vpack.c.bf16 %v1491_v51, %v1491_v51 }
 0x306   : > { %1524 = vst.msk [vmem:[%s2890_s23 + $0x4] sm:$0xf] %vm1522_vm11, %v1507_v4 }
 0x309   : > { %v1455_v1 = vpop.f32.mrf.mxu1 }
 0x30a   : > { %v1492_v32 = vadd.f32 %v3074_v39, %v1455_v1 }
 0x30c   : > { %v1508_v15 = vpack.c.bf16 %v1492_v32, %v1492_v32 }
 0x30e   : > { %1525 = vst.msk [vmem:[%s2890_s23 + $0x8] sm:$0xf] %vm1522_vm11, %v1508_v15 }
 0x311   : > { %v1457_v33 = vpop.f32.mrf.mxu1 }
 0x312   : > { %v1493_v60 = vadd.f32 %v3075_v40, %v1457_v33 }
 0x314   : > { %v1509_v62 = vpack.c.bf16 %v1493_v60, %v1493_v60 }
 0x316   : > { %1526 = vst.msk [vmem:[%s2890_s23 + $0xc] sm:$0xf] %vm1522_vm11, %v1509_v62 }
 0x319   : > { %v1460_v7 = vpop.f32.mrf.mxu1 }
 0x31a   : > { %v1494_v36 = vadd.f32 %v3076_v26, %v1460_v7 }
 0x31c   : > { %v1510_v63 = vpack.c.bf16 %v1494_v36, %v1494_v36 }
 0x31e   : > { %1527 = vst.msk [vmem:[%s2890_s23 + $0x10] sm:$0xf] %vm1522_vm11, %v1510_v63 }
 0x321   : > { %v1462_v47 = vpop.f32.mrf.mxu1 }
 0x322   : > { %v1495_v56 = vadd.f32 %v3077_v11, %v1462_v47 }
 0x324   : > { %v1511_v31 = vpack.c.bf16 %v1495_v56, %v1495_v56 }
 0x326   : > { %1528 = vst.msk [vmem:[%s2890_s23 + $0x14] sm:$0xf] %vm1522_vm11, %v1511_v31 }
 0x329   : > { %v1465_v27 = vpop.f32.mrf.mxu1 }
 0x32a   : > { %v1496_v2 = vadd.f32 %v3078_v58, %v1465_v27 }
 0x32c   : > { %v1512_v44 = vpack.c.bf16 %v1496_v2, %v1496_v2 }
 0x32e   : > { %1529 = vst.msk [vmem:[%s2890_s23 + $0x18] sm:$0xf] %vm1522_vm11, %v1512_v44 }
 0x331   : > { %v1467_v5 = vpop.f32.mrf.mxu1 }
 0x332   : > { %v1497_v23 = vadd.f32 %v3079_v52, %v1467_v5 }
 0x334   : > { %v1513_v46 = vpack.c.bf16 %v1497_v23, %v1497_v23 }
 0x336   : > { %1530 = vst.msk [vmem:[%s2890_s23 + $0x1c] sm:$0xf] %vm1522_vm11, %v1513_v46 }
 0x339   : > { %v1470_v41 = vpop.f32.mrf.mxu1 }
 0x33a   : > { %v1498_v19 = vadd.f32 %v3080_v54, %v1470_v41 }
 0x33c   : > { %v1514_v21 = vpack.c.bf16 %v1498_v19, %v1498_v19 }
 0x33e   : > { %1531 = vst.msk [vmem:[%s2890_s23 + $0x20] sm:$0xf] %vm1522_vm11, %v1514_v21 }
 0x341   : > { %v1472_v35 = vpop.f32.mrf.mxu1 }
 0x342   : > { %v1499_v30 = vadd.f32 %v3081_v57, %v1472_v35 }
 0x344   : > { %v1515_v25 = vpack.c.bf16 %v1499_v30, %v1499_v30 }
 0x346   : > { %1532 = vst.msk [vmem:[%s2890_s23 + $0x24] sm:$0xf] %vm1522_vm11, %v1515_v25 }
 0x349   : > { %v1475_v55 = vpop.f32.mrf.mxu1 }
 0x34a   : > { %v1500_v49 = vadd.f32 %v3082_v43, %v1475_v55 }
 0x34c   : > { %v1516_v12 = vpack.c.bf16 %v1500_v49, %v1500_v49 }
 0x34e   : > { %1533 = vst.msk [vmem:[%s2890_s23 + $0x28] sm:$0xf] %vm1522_vm11, %v1516_v12 }
 0x351   : > { %v1477_v0 = vpop.f32.mrf.mxu1 }
 0x352   : > { %v1501_v18 = vadd.f32 %v3084_v50, %v1477_v0 }
 0x354   : > { %v1517_v48 = vpack.c.bf16 %v1501_v18, %v1501_v18 }
 0x356   : > { %1534 = vst.msk [vmem:[%s2890_s23 + $0x2c] sm:$0xf] %vm1522_vm11, %v1517_v48 }
 0x359   : > { %v1480_v8 = vpop.f32.mrf.mxu1 }
 0x35a   : > { %v1502_v6 = vadd.f32 %v3085_v16, %v1480_v8 }
 0x35c   : > { %v1518_v53 = vpack.c.bf16 %v1502_v6, %v1502_v6 }
 0x35e   : > { %1535 = vst.msk [vmem:[%s2890_s23 + $0x30] sm:$0xf] %vm1522_vm11, %v1518_v53 }
 0x361   : > { %v1482_v45 = vpop.f32.mrf.mxu1 }
 0x362   : > { %v1503_v13 = vadd.f32 %v3086_v20, %v1482_v45 }
 0x364   : > { %v1519_v10 = vpack.c.bf16 %v1503_v13, %v1503_v13 }
 0x366   : > { %1536 = vst.msk [vmem:[%s2890_s23 + $0x34] sm:$0xf] %vm1522_vm11, %v1519_v10 }
 0x369   : > { %v1485_v24 = vpop.f32.mrf.mxu1 }
 0x36a   : > { %v1504_v22 = vadd.f32 %v3087_v38, %v1485_v24 }
 0x36c   : > { %v1520_v3 = vpack.c.bf16 %v1504_v22, %v1504_v22 }
 0x36e   : > { %1537 = vst.msk [vmem:[%s2890_s23 + $0x38] sm:$0xf] %vm1522_vm11, %v1520_v3 }
 0x371   : > { %v1487_v42 = vpop.f32.mrf.mxu1 }
 0x372   : > { %v1505_v29 = vadd.f32 %v3090_v17, %v1487_v42 }
 0x374   : > { %v1521_v37 = vpack.c.bf16 %v1505_v29, %v1505_v29 }
 0x376   : > { %1538 = vst.msk [vmem:[%s2890_s23 + $0x3c] sm:$0xf] %vm1522_vm11, %v1521_v37 }
 0x377   : > { %1975 = shalt.err (!%p1972_p6)
}
 0x378   : > { %s2076_s20 = smov 64   ;;  %s2077_s23 = smov 4  }
 0x379   : > { %1808 = dma.vmem_to_hbm [thread:$0]  (%p2205_p12), %s1556_s11, 1024, %s1558_s24, %s1540_s26, %s2076_s20, %s2076_s20, %s2077_s23  }
 0x37a PF: > { %p1819_p8 = scmp.ge.s32.totalorder %s2070_s15, 2  ;;  %s1572_s14 = sand.u32 1, %s2030_s27  }
 0x37b   : > { %s1573_s16 = scalar_lea.sflag [#allocation4], %s1572_s14 }
 0x37c   : > { %p1815_p3 = pnand %p1819_p8, %p2218_p2 }
 0x37e   : > { %p1816_p7 = pneg %p1815_p3 }
 0x380   : > { %2025 = dma.done.wait (%p1816_p7), %s1573_s16, 1024  }
 0x381   : > { %2027 = vsyncadd (%p1816_p7), %s1573_s16, 4294966272  ;;  %s24_s15 = sadd.s32 1, %s2070_s15   ;;  %s3091_s17 = sld [smem:[#allocation15_spill]] }
 0x382   : > { %p21_p9 = scmp.ge.s32.totalorder %s24_s15, 6   ;;  %s3092_s11 = sld [smem:[#allocation14_spill]] }
 0x383   : > { %s3093_s24 = sld [smem:[#allocation9_spill]]  ;;  %s3097_s27 = smov %s2034_s28 }
 0x384   : > { %s3094_s12 = sld [smem:[#allocation10_spill]]  ;;  %s3098_s28 = smov %s2038_s29 }
 0x385   : > { %s3095_s13 = sld [smem:[#allocation11_spill]]  ;;  %s3100_s30 = smov %s2046_s9 }
 0x386   : > { %s3096_s14 = sld [smem:[#allocation12_spill]]  ;;  %s3101_s9 = smov %s2050_s10 }
 0x387   : > { %s3099_s29 = smov %s3091_s17  ;;  %23 = sbr.rel (!%p21_p9) target bundleno = 11 (0xb), region = 102 }
 0x388   : > { %s3102_s10 = smov %s3092_s11 }
 0x389   : > { %s3103_s11 = smov %s3093_s24 }
 0x38c   :  { %1579 = vsyncpa [#allocation3], 1 }
 0x38d   :  { %1581 = vsyncpa [#allocation3 + $0x1], 1 }
 0x38e   :  { %1582 = vsyncpa [#allocation4], 1 }
 0x38f   :  { %1584 = vsyncpa [#allocation4 + $0x1], 1 }

</bundles_post_ra>
